<compile_context>
chip_gen: v7x
topology: tpu7x:2x2x1
jax: 0.10.0
libtpu: 0.0.40
codegen_flags: <defaults>
</compile_context>

<pallas_src>
import functools

import jax
import jax.numpy as jnp
from jax.experimental import pallas as pl
from jax.experimental.pallas import tpu as pltpu

EMB = 64          # self.embedding_size
HID = 256         # hidden width of the dense() encoders
LN_EPS = 1e-5     # nn.LayerNorm default eps
NORM_EPS = 1e-12  # F.normalize default eps
ATTENTION_COMPONENTS = ("layernorm", "w_v")   # conf['attention']

ENC_ROW_TILE = 512    # item-table stage: big M tile fills MXU rows per weight load
ATTN_ROW_TILE = 512   # attention stage is light; big tile amortizes per-step overhead


# --------------------------------- helpers -----------------------------------
def _round_up(n, m):
    return ((n + m - 1) // m) * m


def _pick_tile(n, preferred, align=16):
    # Biggest tile we pad n to; keep sublane dims multiples of 16 (bf16 tiling,
    # and the stage-2 two-token packing needs an even tile).
    if n >= preferred:
        return preferred
    return _round_up(n, align)


def _pad_rows(x, n_pad):
    n = x.shape[0]
    if n == n_pad:
        return x
    return jnp.pad(x, ((0, n_pad - n),) + ((0, 0),) * (x.ndim - 1))


def _resident_spec(arr, single_buffer):
    # Full-array block at index (0,...,0) every grid step.  With
    # single_buffer=True it is single-buffered (pl.Buffered(1)): the block
    # index never changes, so double-buffering only doubles VMEM.
    nd = arr.ndim
    index_map = lambda *_: (0,) * nd
    if single_buffer:
        return pl.BlockSpec(arr.shape, index_map, pipeline_mode=pl.Buffered(1))
    return pl.BlockSpec(arr.shape, index_map)


def _padded_bytes(shape, dtype):
    # VMEM footprint of one buffer of `shape`, last two dims padded to the
    # (sublane, lane) tile.
    shape = list(shape)
    if len(shape) >= 1:
        shape[-1] = _round_up(shape[-1], 128)
    if len(shape) >= 2:
        shape[-2] = _round_up(shape[-2], 16)
    n = 1
    for s in shape:
        n *= int(s)
    return n * jnp.dtype(dtype).itemsize


def _vmem_limit(budget_bytes):
    # Explicit scoped-VMEM limit from the actual tile+weight budget, with
    # headroom for spills/compiler scratch, clamped to v7x's 64 MiB physical.
    return int(min(max(2 * budget_bytes + (4 << 20), 16 << 20), 64 << 20))


# ----------------- stage 1: fused per-item feature-table kernel --------------
def _item_table_kernel(mw_ref, c_ref, t_ref, cf_ref, ie_ref, mask_ref,
                       cw1, cb1, cw2, cb2, cw3, cb3,
                       tw1, tb1, tw2, tb2, tw3, tb3,
                       cfw, cfb, o_ref):
    def bdot(x, w_ref_):
        # bf16 MXU operands, f32 accumulate (~3x MXU throughput vs f32 passes).
        return jnp.dot(x.astype(jnp.bfloat16), w_ref_[...],
                       preferred_element_type=jnp.float32)

    def mlp(x, w1, b1, w2, b2, w3, b3):   # Linear->ReLU->Linear->ReLU->Linear
        h = jnp.maximum(bdot(x, w1) + b1[...], 0.0)
        h = jnp.maximum(bdot(h, w2) + b2[...], 0.0)
        return bdot(h, w3) + b3[...]

    def l2n(x):                            # F.normalize(dim=-1)
        nrm = jnp.sqrt(jnp.sum(x * x, axis=-1, keepdims=True))
        return x / jnp.maximum(nrm, NORM_EPS)

    c_feat = mlp(c_ref[...], cw1, cb1, cw2, cb2, cw3, cb3)
    t_feat = mlp(t_ref[...], tw1, tb1, tw2, tb2, tw3, tb3)
    mm = mw_ref[0:1, :] * l2n(c_feat) + mw_ref[1:2, :] * l2n(t_feat)

    cf = bdot(cf_ref[...], cfw) + cfb[...]
    cf = jnp.where(mask_ref[...] > 0.5, cf, mm)   # cold cf items fall back to mm

    # Direct 64-wide sub-slice stores (no lane-concat relayout); bf16 table
    # halves the inter-stage HBM round trip.  Layout: [mm | item_embedding | cf]
    o_ref[:, 0:EMB] = mm.astype(o_ref.dtype)
    o_ref[:, EMB:2 * EMB] = ie_ref[...].astype(o_ref.dtype)
    o_ref[:, 2 * EMB:3 * EMB] = cf.astype(o_ref.dtype)


def build_item_table(content, text, cf_feat, item_emb, items_in_cf, mw,
                     c_params, t_params, cf_w, cf_b, row_tile=ENC_ROW_TILE):
    n = content.shape[0]
    tile = _pick_tile(n, row_tile)
    n_pad = _round_up(n, tile)

    content_p = _pad_rows(content, n_pad)
    text_p = _pad_rows(text, n_pad)
    cf_p = _pad_rows(cf_feat, n_pad)
    ie_p = _pad_rows(item_emb, n_pad)
    mask_p = _pad_rows(items_in_cf.astype(jnp.float32)[:, None], n_pad)
    mw_b = jnp.broadcast_to(mw.astype(jnp.float32)[:, None], (2, EMB))

    def bf16_mlp(p):
        w1, b1, w2, b2, w3, b3 = p
        return (w1.astype(jnp.bfloat16), b1, w2.astype(jnp.bfloat16), b2,
                w3.astype(jnp.bfloat16), b3)

    cw1, cb1, cw2, cb2, cw3, cb3 = bf16_mlp(c_params)
    tw1, tb1, tw2, tb2, tw3, tb3 = bf16_mlp(t_params)
    weights = (cw1, cb1, cw2, cb2, cw3, cb3,
               tw1, tb1, tw2, tb2, tw3, tb3,
               cf_w.astype(jnp.bfloat16), cf_b)

    row_inputs = (content_p, text_p, cf_p, ie_p, mask_p)

    def row_spec(arr):
        f = arr.shape[1]
        return pl.BlockSpec((tile, f), lambda i: (i, 0))

    def build(single_buffer):
        wbuf = 1 if single_buffer else 2
        budget = (sum(2 * _padded_bytes((tile, a.shape[1]), a.dtype) for a in row_inputs)
                  + wbuf * sum(_padded_bytes(w.shape, w.dtype) for w in (mw_b,) + weights)
                  + 2 * _padded_bytes((tile, 3 * EMB), jnp.bfloat16))
        return pl.pallas_call(
            _item_table_kernel,
            out_shape=jax.ShapeDtypeStruct((n_pad, 3 * EMB), jnp.bfloat16),
            grid=(n_pad // tile,),
            in_specs=[_resident_spec(mw_b, single_buffer)]
                     + [row_spec(a) for a in row_inputs]
                     + [_resident_spec(w, single_buffer) for w in weights],
            out_specs=pl.BlockSpec((tile, 3 * EMB), lambda i: (i, 0)),
            compiler_params=pltpu.CompilerParams(
                dimension_semantics=("parallel",),
                vmem_limit_bytes=_vmem_limit(budget)),
        )

    args = (mw_b,) + row_inputs + weights
    try:
        return build(True)(*args)
    except Exception:
        # pl.Buffered(1) single-buffering rejected by this jax/libtpu build;
        # fall back to default double-buffered resident weights.
        return build(False)(*args)


# ------------- stage 2: fused 3-modal self-attention over tokens -------------
def _self_attention_kernel(x_ref, w_ref, o_ref, *, use_wv, use_ln):
    tile = x_ref.shape[0]
    scale = EMB ** (-0.5)
    x = x_ref[...].astype(jnp.float32)    # bf16 table rows -> f32 for the math

    def prep(v):
        # F.normalize(dim=-1) then nn.LayerNorm(64, affine=False)
        nrm = jnp.sqrt(jnp.sum(v * v, axis=-1, keepdims=True))
        v = v / jnp.maximum(nrm, NORM_EPS)
        if use_ln:
            mu = jnp.mean(v, axis=-1, keepdims=True)
            var = jnp.mean(jnp.square(v - mu), axis=-1, keepdims=True)
            v = (v - mu) * jax.lax.rsqrt(var + LN_EPS)
        return v

    f = [prep(x[:, i * EMB:(i + 1) * EMB]) for i in range(3)]

    # Three [tile,64]@[64,192] bf16 dots: the RHS stays loaded across modal
    # slabs and the LHS is never split/re-concatenated along sublanes.
    w = w_ref[...]
    q, k, v = [], [], []
    for i in range(3):
        qkv = jnp.dot(f[i].astype(jnp.bfloat16), w,
                      preferred_element_type=jnp.float32)
        q.append(qkv[:, 0:EMB])
        k.append(qkv[:, EMB:2 * EMB])
        v.append(qkv[:, 2 * EMB:3 * EMB] if use_wv else f[i])

    out_sum = jnp.zeros((tile, EMB), jnp.float32)
    for i in range(3):  # attention row i over the 3 modal keys, then mean over i
        # 9 XLU lane reductions total; MXU is not the bottleneck in this stage.
        l = [scale * jnp.sum(q[i] * k[j], axis=-1, keepdims=True) for j in range(3)]
        m = jnp.maximum(jnp.maximum(l[0], l[1]), l[2])
        e = [jnp.exp(lj - m) for lj in l]
        denom = e[0] + e[1] + e[2]
        inv = pl.reciprocal(denom, approx=True)   # EUP slot
        inv = inv * (2.0 - denom * inv)           # one Newton step -> ~f32 accuracy
        out_sum = out_sum + (e[0] * v[0] + e[1] * v[1] + e[2] * v[2]) * inv

    out = out_sum * (1.0 / 3.0)                    # features.mean(dim=-2)
    # Lane-dense output: pack two tokens per 128-lane row (unmasked vst);
    # the wrapper reshape recovers [m, 64] token-major order.
    o_ref[...] = out.reshape(tile // 2, 2 * EMB)


def self_attention(feats, wqkv, *, use_wv, use_ln, row_tile=ATTN_ROW_TILE):
    m, fdim = feats.shape
    tile = _pick_tile(m, row_tile)                # even tile (multiple of 16)
    m_pad = _round_up(m, tile)
    x = _pad_rows(feats, m_pad)
    w = wqkv.astype(jnp.bfloat16)

    kernel = functools.partial(_self_attention_kernel, use_wv=use_wv, use_ln=use_ln)

    def build(single_buffer):
        wbuf = 1 if single_buffer else 2
        budget = (2 * _padded_bytes((tile, fdim), x.dtype)
                  + wbuf * _padded_bytes(w.shape, w.dtype)
                  + 2 * _padded_bytes((tile // 2, 2 * EMB), jnp.float32))
        return pl.pallas_call(
            kernel,
            out_shape=jax.ShapeDtypeStruct((m_pad // 2, 2 * EMB), jnp.float32),
            grid=(m_pad // tile,),
            in_specs=[pl.BlockSpec((tile, fdim), lambda i: (i, 0)),
                      _resident_spec(w, single_buffer)],
            out_specs=pl.BlockSpec((tile // 2, 2 * EMB), lambda i: (i, 0)),
            compiler_params=pltpu.CompilerParams(
                dimension_semantics=("parallel",),
                vmem_limit_bytes=_vmem_limit(budget)),
        )

    try:
        out = build(True)(x, w)
    except Exception:
        # pl.Buffered(1) unsupported on this build; retry double-buffered.
        out = build(False)(x, w)
    return out.reshape(m_pad, EMB)[:m]


# --------------------------------- forward -----------------------------------
def hierachical_encoder_forward(params, buffers, seq_modify):
    num_item = buffers["num_item"]
    bs, n_token = seq_modify.shape
    # seq_modify.masked_fill_(seq_modify == num_item, 0)
    seq = jnp.where(seq_modify == num_item, 0, seq_modify).reshape(-1)

    mw = jax.nn.softmax(params["modal_weight"], axis=0)
    table = build_item_table(
        buffers["content_feature"], buffers["text_feature"], buffers["cf_feature"],
        params["item_embeddings"], buffers["items_in_cf"], mw,
        params["c_encoder"], params["t_encoder"], params["cf_w"], params["cf_b"])

    # single bf16 192-wide gather (half the HBM traffic of the f32 version);
    # padded table rows are never gathered (seq indices < num_item).
    feats = jnp.take(table, seq, axis=0)

    use_wv = "w_v" in ATTENTION_COMPONENTS
    use_ln = "layernorm" in ATTENTION_COMPONENTS
    if use_wv:
        wqkv = jnp.concatenate([params["w_q"], params["w_k"], params["w_v"]], axis=1)
    else:
        wqkv = jnp.concatenate([params["w_q"], params["w_k"]], axis=1)

    y = self_attention(feats, wqkv, use_wv=use_wv, use_ln=use_ln)
    return y.reshape(bs, n_token, EMB)


# -------------------------- pure-JAX reference -------------------------------
def _l2_normalize(x):
    return x / jnp.maximum(jnp.linalg.norm(x, axis=-1, keepdims=True), NORM_EPS)


def reference_forward(params, buffers, seq_modify):
    num_item = buffers["num_item"]
    bs, n_token = seq_modify.shape
    seq = jnp.where(seq_modify == num_item, 0, seq_modify).reshape(-1)

    def mlp(x, p):
        w1, b1, w2, b2, w3, b3 = p
        h = jnp.maximum(x @ w1 + b1, 0.0)
        h = jnp.maximum(h @ w2 + b2, 0.0)
        return h @ w3 + b3

    c_feat = mlp(buffers["content_feature"], params["c_encoder"])
    t_feat = mlp(buffers["text_feature"], params["t_encoder"])
    mw = jax.nn.softmax(params["modal_weight"], axis=0)
    mm_full = mw[0] * _l2_normalize(c_feat) + mw[1] * _l2_normalize(t_feat)
    cf_trans = buffers["cf_feature"] @ params["cf_w"] + params["cf_b"]
    cf_full = jnp.where(buffers["items_in_cf"][:, None], cf_trans, mm_full)

    feats = jnp.stack(
        [jnp.take(mm_full, seq, axis=0),
         jnp.take(params["item_embeddings"], seq, axis=0),
         jnp.take(cf_full, seq, axis=0)], axis=-2)          # [M, 3, 64]
    f = _l2_normalize(feats)
    if "layernorm" in ATTENTION_COMPONENTS:
        mu = jnp.mean(f, axis=-1, keepdims=True)
        var = jnp.mean(jnp.square(f - mu), axis=-1, keepdims=True)
        f = (f - mu) / jnp.sqrt(var + LN_EPS)
    q = f @ params["w_q"]
    k = f @ params["w_k"]
    v = f @ params["w_v"] if "w_v" in ATTENTION_COMPONENTS else f
    attn = jax.nn.softmax((q * EMB ** (-0.5)) @ jnp.swapaxes(k, -1, -2), axis=-1)
    y = (attn @ v).mean(axis=-2)
    return y.reshape(bs, n_token, EMB)


# ------------------------------- init helpers --------------------------------
def xavier_normal(key, fan_in, fan_out):
    std = (2.0 / (fan_in + fan_out)) ** 0.5
    return std * jax.random.normal(key, (fan_in, fan_out), jnp.float32)


def xavier_uniform(key, fan_in, fan_out, shape):
    a = (6.0 / (fan_in + fan_out)) ** 0.5
    return jax.random.uniform(key, shape, jnp.float32, -a, a)


def make_dense_params(key, feat_dim):
    k1, k2, k3 = jax.random.split(key, 3)
    return (
        xavier_normal(k1, feat_dim, feat_dim), jnp.zeros((1, feat_dim), jnp.float32),
        xavier_normal(k2, feat_dim, HID),      jnp.zeros((1, HID), jnp.float32),
        xavier_normal(k3, HID, EMB),           jnp.zeros((1, EMB), jnp.float32),
    )


if __name__ == "__main__":
    num_user, num_item = 4, 16
    content_dim, text_dim = 32, 48
    bs, n_token = 2, 8

    key = jax.random.PRNGKey(0)
    keys = jax.random.split(key, 12)

    # features (module __init__ L2-normalizes content/text features)
    content_feature = _l2_normalize(jax.random.normal(keys[0], (num_item, content_dim)))
    text_feature = _l2_normalize(jax.random.normal(keys[1], (num_item, text_dim)))
    cf_feature = jax.random.normal(keys[2], (num_item, EMB))
    ui_graph = (jax.random.uniform(keys[3], (num_user, num_item)) < 0.5)
    items_in_cf = jnp.any(ui_graph, axis=0)                 # warm/cold split for cf

    params = {
        "c_encoder": make_dense_params(keys[4], content_dim),
        "t_encoder": make_dense_params(keys[5], text_dim),
        "item_embeddings": xavier_uniform(keys[6], EMB, num_item, (num_item, EMB)),
        "cf_w": xavier_normal(keys[7], EMB, EMB),
        "cf_b": jnp.zeros((1, EMB), jnp.float32),
        "w_q": xavier_normal(keys[8], EMB, EMB),
        "w_k": xavier_normal(keys[9], EMB, EMB),
        "w_v": xavier_normal(keys[10], EMB, EMB),
        "modal_weight": jnp.array([0.5, 0.5], jnp.float32),
    }
    buffers = {
        "content_feature": content_feature,
        "text_feature": text_feature,
        "cf_feature": cf_feature,
        "items_in_cf": items_in_cf,
        "num_item": num_item,
    }

    # seq_modify includes padding token == num_item (gets masked to 0)
    seq_modify = jax.random.randint(keys[11], (bs, n_token), 0, num_item + 1)

    out = hierachical_encoder_forward(params, buffers, seq_modify)
    out = jax.block_until_ready(out)

    ref = jax.block_until_ready(reference_forward(params, buffers, seq_modify))
    assert out.shape == (bs, n_token, EMB)
    max_diff = float(jnp.abs(out - ref).max())
    # tolerance covers the bf16 inter-stage table + bf16 MXU operands
    # (f32 accumulation) + EUP approx-reciprocal (+ Newton step), vs f32 ref.
    assert jnp.allclose(out, ref, atol=5e-2, rtol=5e-2), f"max diff {max_diff}"

    print("KERNEL_OK")
</pallas_src>

<mosaic_0001>
module attributes {stable_mosaic.version = 11 : i64} {
  func.func @_item_table_kernel(%arg0: i32, %arg1: memref<2x64xf32, #tpu.memory_space<vmem>>, %arg2: memref<16x32xf32, #tpu.memory_space<vmem>>, %arg3: memref<16x48xf32, #tpu.memory_space<vmem>>, %arg4: memref<16x64xf32, #tpu.memory_space<vmem>>, %arg5: memref<16x64xf32, #tpu.memory_space<vmem>>, %arg6: memref<16x1xf32, #tpu.memory_space<vmem>>, %arg7: memref<32x32xbf16, #tpu.memory_space<vmem>>, %arg8: memref<1x32xf32, #tpu.memory_space<vmem>>, %arg9: memref<32x256xbf16, #tpu.memory_space<vmem>>, %arg10: memref<1x256xf32, #tpu.memory_space<vmem>>, %arg11: memref<256x64xbf16, #tpu.memory_space<vmem>>, %arg12: memref<1x64xf32, #tpu.memory_space<vmem>>, %arg13: memref<48x48xbf16, #tpu.memory_space<vmem>>, %arg14: memref<1x48xf32, #tpu.memory_space<vmem>>, %arg15: memref<48x256xbf16, #tpu.memory_space<vmem>>, %arg16: memref<1x256xf32, #tpu.memory_space<vmem>>, %arg17: memref<256x64xbf16, #tpu.memory_space<vmem>>, %arg18: memref<1x64xf32, #tpu.memory_space<vmem>>, %arg19: memref<64x64xbf16, #tpu.memory_space<vmem>>, %arg20: memref<1x64xf32, #tpu.memory_space<vmem>>, %arg21: memref<16x192xbf16, #tpu.memory_space<vmem>>) attributes {dimension_semantics = [#tpu.dimension_semantics<parallel>], iteration_bounds = array<i64: 1>, scalar_prefetch = 0 : i64, scratch_operands = 0 : i64, tpu.core_type = #tpu.core_type<tc>, window_params = [{pipeline_mode = #tpu.pipeline_mode<synchronous>, transform_indices = @transform_0, window_bounds = array<i64: 2, 64>}, {transform_indices = @transform_1, window_bounds = array<i64: 16, 32>}, {transform_indices = @transform_2, window_bounds = array<i64: 16, 48>}, {transform_indices = @transform_3, window_bounds = array<i64: 16, 64>}, {transform_indices = @transform_4, window_bounds = array<i64: 16, 64>}, {transform_indices = @transform_5, window_bounds = array<i64: 16, 1>}, {pipeline_mode = #tpu.pipeline_mode<synchronous>, transform_indices = @transform_6, window_bounds = array<i64: 32, 32>}, {pipeline_mode = #tpu.pipeline_mode<synchronous>, transform_indices = @transform_7, window_bounds = array<i64: 1, 32>}, {pipeline_mode = #tpu.pipeline_mode<synchronous>, transform_indices = @transform_8, window_bounds = array<i64: 32, 256>}, {pipeline_mode = #tpu.pipeline_mode<synchronous>, transform_indices = @transform_9, window_bounds = array<i64: 1, 256>}, {pipeline_mode = #tpu.pipeline_mode<synchronous>, transform_indices = @transform_10, window_bounds = array<i64: 256, 64>}, {pipeline_mode = #tpu.pipeline_mode<synchronous>, transform_indices = @transform_11, window_bounds = array<i64: 1, 64>}, {pipeline_mode = #tpu.pipeline_mode<synchronous>, transform_indices = @transform_12, window_bounds = array<i64: 48, 48>}, {pipeline_mode = #tpu.pipeline_mode<synchronous>, transform_indices = @transform_13, window_bounds = array<i64: 1, 48>}, {pipeline_mode = #tpu.pipeline_mode<synchronous>, transform_indices = @transform_14, window_bounds = array<i64: 48, 256>}, {pipeline_mode = #tpu.pipeline_mode<synchronous>, transform_indices = @transform_15, window_bounds = array<i64: 1, 256>}, {pipeline_mode = #tpu.pipeline_mode<synchronous>, transform_indices = @transform_16, window_bounds = array<i64: 256, 64>}, {pipeline_mode = #tpu.pipeline_mode<synchronous>, transform_indices = @transform_17, window_bounds = array<i64: 1, 64>}, {pipeline_mode = #tpu.pipeline_mode<synchronous>, transform_indices = @transform_18, window_bounds = array<i64: 64, 64>}, {pipeline_mode = #tpu.pipeline_mode<synchronous>, transform_indices = @transform_19, window_bounds = array<i64: 1, 64>}, {transform_indices = @transform_20, window_bounds = array<i64: 16, 192>}]} {
    %c0 = arith.constant 0 : index
    %c0_0 = arith.constant 0 : index
    %0 = vector.load %arg2[%c0, %c0_0] : memref<16x32xf32, #tpu.memory_space<vmem>>, vector<16x32xf32>
    %1 = arith.truncf %0 : vector<16x32xf32> to vector<16x32xbf16>
    %c0_1 = arith.constant 0 : index
    %c0_2 = arith.constant 0 : index
    %2 = vector.load %arg7[%c0_1, %c0_2] : memref<32x32xbf16, #tpu.memory_space<vmem>>, vector<32x32xbf16>
    %cst = arith.constant dense<0.000000e+00> : vector<16x32xf32>
    %3 = tpu.matmul %1, %2, %cst {dimension_numbers = #tpu.dot_dimension_numbers<[1], [0], [0], [1], [0, 0, 1, 1], [], []>} : vector<16x32xbf16>, vector<32x32xbf16>, vector<16x32xf32> -> vector<16x32xf32>
    %c0_3 = arith.constant 0 : index
    %c0_4 = arith.constant 0 : index
    %4 = vector.load %arg8[%c0_3, %c0_4] : memref<1x32xf32, #tpu.memory_space<vmem>>, vector<1x32xf32>
    %5 = vector.broadcast %4 : vector<1x32xf32> to vector<16x32xf32>
    %6 = arith.addf %3, %5 : vector<16x32xf32>
    %cst_5 = arith.constant 0.000000e+00 : f32
    %7 = vector.broadcast %cst_5 : f32 to vector<16x32xf32>
    %8 = arith.maximumf %6, %7 : vector<16x32xf32>
    %9 = arith.truncf %8 : vector<16x32xf32> to vector<16x32xbf16>
    %c0_6 = arith.constant 0 : index
    %c0_7 = arith.constant 0 : index
    %10 = vector.load %arg9[%c0_6, %c0_7] : memref<32x256xbf16, #tpu.memory_space<vmem>>, vector<32x256xbf16>
    %cst_8 = arith.constant dense<0.000000e+00> : vector<16x256xf32>
    %11 = tpu.matmul %9, %10, %cst_8 {dimension_numbers = #tpu.dot_dimension_numbers<[1], [0], [0], [1], [0, 0, 1, 1], [], []>} : vector<16x32xbf16>, vector<32x256xbf16>, vector<16x256xf32> -> vector<16x256xf32>
    %c0_9 = arith.constant 0 : index
    %c0_10 = arith.constant 0 : index
    %12 = vector.load %arg10[%c0_9, %c0_10] : memref<1x256xf32, #tpu.memory_space<vmem>>, vector<1x256xf32>
    %13 = vector.broadcast %12 : vector<1x256xf32> to vector<16x256xf32>
    %14 = arith.addf %11, %13 : vector<16x256xf32>
    %cst_11 = arith.constant 0.000000e+00 : f32
    %15 = vector.broadcast %cst_11 : f32 to vector<16x256xf32>
    %16 = arith.maximumf %14, %15 : vector<16x256xf32>
    %17 = arith.truncf %16 : vector<16x256xf32> to vector<16x256xbf16>
    %c0_12 = arith.constant 0 : index
    %c0_13 = arith.constant 0 : index
    %18 = vector.load %arg11[%c0_12, %c0_13] : memref<256x64xbf16, #tpu.memory_space<vmem>>, vector<256x64xbf16>
    %cst_14 = arith.constant dense<0.000000e+00> : vector<16x64xf32>
    %19 = tpu.matmul %17, %18, %cst_14 {dimension_numbers = #tpu.dot_dimension_numbers<[1], [0], [0], [1], [0, 0, 1, 1], [], []>} : vector<16x256xbf16>, vector<256x64xbf16>, vector<16x64xf32> -> vector<16x64xf32>
    %c0_15 = arith.constant 0 : index
    %c0_16 = arith.constant 0 : index
    %20 = vector.load %arg12[%c0_15, %c0_16] : memref<1x64xf32, #tpu.memory_space<vmem>>, vector<1x64xf32>
    %21 = vector.broadcast %20 : vector<1x64xf32> to vector<16x64xf32>
    %22 = arith.addf %19, %21 : vector<16x64xf32>
    %c0_17 = arith.constant 0 : index
    %c0_18 = arith.constant 0 : index
    %23 = vector.load %arg3[%c0_17, %c0_18] : memref<16x48xf32, #tpu.memory_space<vmem>>, vector<16x48xf32>
    %24 = arith.truncf %23 : vector<16x48xf32> to vector<16x48xbf16>
    %c0_19 = arith.constant 0 : index
    %c0_20 = arith.constant 0 : index
    %25 = vector.load %arg13[%c0_19, %c0_20] : memref<48x48xbf16, #tpu.memory_space<vmem>>, vector<48x48xbf16>
    %cst_21 = arith.constant dense<0.000000e+00> : vector<16x48xf32>
    %26 = tpu.matmul %24, %25, %cst_21 {dimension_numbers = #tpu.dot_dimension_numbers<[1], [0], [0], [1], [0, 0, 1, 1], [], []>} : vector<16x48xbf16>, vector<48x48xbf16>, vector<16x48xf32> -> vector<16x48xf32>
    %c0_22 = arith.constant 0 : index
    %c0_23 = arith.constant 0 : index
    %27 = vector.load %arg14[%c0_22, %c0_23] : memref<1x48xf32, #tpu.memory_space<vmem>>, vector<1x48xf32>
    %28 = vector.broadcast %27 : vector<1x48xf32> to vector<16x48xf32>
    %29 = arith.addf %26, %28 : vector<16x48xf32>
    %cst_24 = arith.constant 0.000000e+00 : f32
    %30 = vector.broadcast %cst_24 : f32 to vector<16x48xf32>
    %31 = arith.maximumf %29, %30 : vector<16x48xf32>
    %32 = arith.truncf %31 : vector<16x48xf32> to vector<16x48xbf16>
    %c0_25 = arith.constant 0 : index
    %c0_26 = arith.constant 0 : index
    %33 = vector.load %arg15[%c0_25, %c0_26] : memref<48x256xbf16, #tpu.memory_space<vmem>>, vector<48x256xbf16>
    %cst_27 = arith.constant dense<0.000000e+00> : vector<16x256xf32>
    %34 = tpu.matmul %32, %33, %cst_27 {dimension_numbers = #tpu.dot_dimension_numbers<[1], [0], [0], [1], [0, 0, 1, 1], [], []>} : vector<16x48xbf16>, vector<48x256xbf16>, vector<16x256xf32> -> vector<16x256xf32>
    %c0_28 = arith.constant 0 : index
    %c0_29 = arith.constant 0 : index
    %35 = vector.load %arg16[%c0_28, %c0_29] : memref<1x256xf32, #tpu.memory_space<vmem>>, vector<1x256xf32>
    %36 = vector.broadcast %35 : vector<1x256xf32> to vector<16x256xf32>
    %37 = arith.addf %34, %36 : vector<16x256xf32>
    %cst_30 = arith.constant 0.000000e+00 : f32
    %38 = vector.broadcast %cst_30 : f32 to vector<16x256xf32>
    %39 = arith.maximumf %37, %38 : vector<16x256xf32>
    %40 = arith.truncf %39 : vector<16x256xf32> to vector<16x256xbf16>
    %c0_31 = arith.constant 0 : index
    %c0_32 = arith.constant 0 : index
    %41 = vector.load %arg17[%c0_31, %c0_32] : memref<256x64xbf16, #tpu.memory_space<vmem>>, vector<256x64xbf16>
    %cst_33 = arith.constant dense<0.000000e+00> : vector<16x64xf32>
    %42 = tpu.matmul %40, %41, %cst_33 {dimension_numbers = #tpu.dot_dimension_numbers<[1], [0], [0], [1], [0, 0, 1, 1], [], []>} : vector<16x256xbf16>, vector<256x64xbf16>, vector<16x64xf32> -> vector<16x64xf32>
    %c0_34 = arith.constant 0 : index
    %c0_35 = arith.constant 0 : index
    %43 = vector.load %arg18[%c0_34, %c0_35] : memref<1x64xf32, #tpu.memory_space<vmem>>, vector<1x64xf32>
    %44 = vector.broadcast %43 : vector<1x64xf32> to vector<16x64xf32>
    %45 = arith.addf %42, %44 : vector<16x64xf32>
    %c0_36 = arith.constant 0 : index
    %c0_37 = arith.constant 0 : index
    %46 = vector.load %arg1[%c0_36, %c0_37] : memref<2x64xf32, #tpu.memory_space<vmem>>, vector<1x64xf32>
    %47 = arith.mulf %22, %22 : vector<16x64xf32>
    %cst_38 = arith.constant dense<0.000000e+00> : vector<16xf32>
    %48 = vector.multi_reduction <add>, %47, %cst_38 [1] : vector<16x64xf32> to vector<16xf32>
    %49 = vector.shape_cast %48 : vector<16xf32> to vector<16x1xf32>
    %50 = math.sqrt %49 : vector<16x1xf32>
    %cst_39 = arith.constant 9.99999996E-13 : f32
    %51 = vector.broadcast %cst_39 : f32 to vector<16x1xf32>
    %52 = arith.maximumf %50, %51 : vector<16x1xf32>
    %53 = vector.broadcast %52 : vector<16x1xf32> to vector<16x64xf32>
    %54 = arith.divf %22, %53 : vector<16x64xf32>
    %55 = vector.broadcast %46 : vector<1x64xf32> to vector<16x64xf32>
    %56 = arith.mulf %55, %54 : vector<16x64xf32>
    %c1 = arith.constant 1 : index
    %c0_40 = arith.constant 0 : index
    %57 = vector.load %arg1[%c1, %c0_40] : memref<2x64xf32, #tpu.memory_space<vmem>>, vector<1x64xf32>
    %58 = arith.mulf %45, %45 : vector<16x64xf32>
    %cst_41 = arith.constant dense<0.000000e+00> : vector<16xf32>
    %59 = vector.multi_reduction <add>, %58, %cst_41 [1] : vector<16x64xf32> to vector<16xf32>
    %60 = vector.shape_cast %59 : vector<16xf32> to vector<16x1xf32>
    %61 = math.sqrt %60 : vector<16x1xf32>
    %cst_42 = arith.constant 9.99999996E-13 : f32
    %62 = vector.broadcast %cst_42 : f32 to vector<16x1xf32>
    %63 = arith.maximumf %61, %62 : vector<16x1xf32>
    %64 = vector.broadcast %63 : vector<16x1xf32> to vector<16x64xf32>
    %65 = arith.divf %45, %64 : vector<16x64xf32>
    %66 = vector.broadcast %57 : vector<1x64xf32> to vector<16x64xf32>
    %67 = arith.mulf %66, %65 : vector<16x64xf32>
    %68 = arith.addf %56, %67 : vector<16x64xf32>
    %c0_43 = arith.constant 0 : index
    %c0_44 = arith.constant 0 : index
    %69 = vector.load %arg4[%c0_43, %c0_44] : memref<16x64xf32, #tpu.memory_space<vmem>>, vector<16x64xf32>
    %70 = arith.truncf %69 : vector<16x64xf32> to vector<16x64xbf16>
    %c0_45 = arith.constant 0 : index
    %c0_46 = arith.constant 0 : index
    %71 = vector.load %arg19[%c0_45, %c0_46] : memref<64x64xbf16, #tpu.memory_space<vmem>>, vector<64x64xbf16>
    %cst_47 = arith.constant dense<0.000000e+00> : vector<16x64xf32>
    %72 = tpu.matmul %70, %71, %cst_47 {dimension_numbers = #tpu.dot_dimension_numbers<[1], [0], [0], [1], [0, 0, 1, 1], [], []>} : vector<16x64xbf16>, vector<64x64xbf16>, vector<16x64xf32> -> vector<16x64xf32>
    %c0_48 = arith.constant 0 : index
    %c0_49 = arith.constant 0 : index
    %73 = vector.load %arg20[%c0_48, %c0_49] : memref<1x64xf32, #tpu.memory_space<vmem>>, vector<1x64xf32>
    %74 = vector.broadcast %73 : vector<1x64xf32> to vector<16x64xf32>
    %75 = arith.addf %72, %74 : vector<16x64xf32>
    %c0_50 = arith.constant 0 : index
    %c0_51 = arith.constant 0 : index
    %76 = vector.load %arg6[%c0_50, %c0_51] : memref<16x1xf32, #tpu.memory_space<vmem>>, vector<16x1xf32>
    %cst_52 = arith.constant 5.000000e-01 : f32
    %77 = vector.broadcast %cst_52 : f32 to vector<16x1xf32>
    %78 = arith.cmpf ogt, %76, %77 : vector<16x1xf32>
    %79 = vector.shape_cast %78 : vector<16x1xi1> to vector<16x1xi1>
    %80 = vector.broadcast %79 : vector<16x1xi1> to vector<16x64xi1>
    %81 = arith.select %80, %75, %68 : vector<16x64xi1>, vector<16x64xf32>
    %82 = arith.truncf %68 : vector<16x64xf32> to vector<16x64xbf16>
    %c0_53 = arith.constant 0 : index
    %c0_54 = arith.constant 0 : index
    %83 = vector.load %arg21[%c0_53, %c0_54] : memref<16x192xbf16, #tpu.memory_space<vmem>>, vector<16x64xbf16>
    tpu.vector_store %arg21[%c0_53, %c0_54], %82 {strides = array<i32>} : memref<16x192xbf16, #tpu.memory_space<vmem>>, vector<16x64xbf16>,
    %c0_55 = arith.constant 0 : index
    %c0_56 = arith.constant 0 : index
    %84 = vector.load %arg5[%c0_55, %c0_56] : memref<16x64xf32, #tpu.memory_space<vmem>>, vector<16x64xf32>
    %85 = arith.truncf %84 : vector<16x64xf32> to vector<16x64xbf16>
    %c0_57 = arith.constant 0 : index
    %c64 = arith.constant 64 : index
    %86 = vector.load %arg21[%c0_57, %c64] : memref<16x192xbf16, #tpu.memory_space<vmem>>, vector<16x64xbf16>
    tpu.vector_store %arg21[%c0_57, %c64], %85 {strides = array<i32>} : memref<16x192xbf16, #tpu.memory_space<vmem>>, vector<16x64xbf16>,
    %87 = arith.truncf %81 : vector<16x64xf32> to vector<16x64xbf16>
    %c0_58 = arith.constant 0 : index
    %c128 = arith.constant 128 : index
    %88 = vector.load %arg21[%c0_58, %c128] : memref<16x192xbf16, #tpu.memory_space<vmem>>, vector<16x64xbf16>
    tpu.vector_store %arg21[%c0_58, %c128], %87 {strides = array<i32>} : memref<16x192xbf16, #tpu.memory_space<vmem>>, vector<16x64xbf16>,
    return
  }
  func.func @transform_0(%arg0: i32) -> (i32, i32) {
    %c0_i32 = arith.constant 0 : i32
    %c0_i32_0 = arith.constant 0 : i32
    %c0_i32_1 = arith.constant 0 : i32
    return %c0_i32, %c0_i32_0 : i32, i32
  }
  func.func @transform_1(%arg0: i32) -> (i32, i32) {
    %c0_i32 = arith.constant 0 : i32
    %c0_i32_0 = arith.constant 0 : i32
    return %arg0, %c0_i32 : i32, i32
  }
  func.func @transform_2(%arg0: i32) -> (i32, i32) {
    %c0_i32 = arith.constant 0 : i32
    %c0_i32_0 = arith.constant 0 : i32
    return %arg0, %c0_i32 : i32, i32
  }
  func.func @transform_3(%arg0: i32) -> (i32, i32) {
    %c0_i32 = arith.constant 0 : i32
    %c0_i32_0 = arith.constant 0 : i32
    return %arg0, %c0_i32 : i32, i32
  }
  func.func @transform_4(%arg0: i32) -> (i32, i32) {
    %c0_i32 = arith.constant 0 : i32
    %c0_i32_0 = arith.constant 0 : i32
    return %arg0, %c0_i32 : i32, i32
  }
  func.func @transform_5(%arg0: i32) -> (i32, i32) {
    %c0_i32 = arith.constant 0 : i32
    %c0_i32_0 = arith.constant 0 : i32
    return %arg0, %c0_i32 : i32, i32
  }
  func.func @transform_6(%arg0: i32) -> (i32, i32) {
    %c0_i32 = arith.constant 0 : i32
    %c0_i32_0 = arith.constant 0 : i32
    %c0_i32_1 = arith.constant 0 : i32
    return %c0_i32, %c0_i32_0 : i32, i32
  }
  func.func @transform_7(%arg0: i32) -> (i32, i32) {
    %c0_i32 = arith.constant 0 : i32
    %c0_i32_0 = arith.constant 0 : i32
    %c0_i32_1 = arith.constant 0 : i32
    return %c0_i32, %c0_i32_0 : i32, i32
  }
  func.func @transform_8(%arg0: i32) -> (i32, i32) {
    %c0_i32 = arith.constant 0 : i32
    %c0_i32_0 = arith.constant 0 : i32
    %c0_i32_1 = arith.constant 0 : i32
    return %c0_i32, %c0_i32_0 : i32, i32
  }
  func.func @transform_9(%arg0: i32) -> (i32, i32) {
    %c0_i32 = arith.constant 0 : i32
    %c0_i32_0 = arith.constant 0 : i32
    %c0_i32_1 = arith.constant 0 : i32
    return %c0_i32, %c0_i32_0 : i32, i32
  }
  func.func @transform_10(%arg0: i32) -> (i32, i32) {
    %c0_i32 = arith.constant 0 : i32
    %c0_i32_0 = arith.constant 0 : i32
    %c0_i32_1 = arith.constant 0 : i32
    return %c0_i32, %c0_i32_0 : i32, i32
  }
  func.func @transform_11(%arg0: i32) -> (i32, i32) {
    %c0_i32 = arith.constant 0 : i32
    %c0_i32_0 = arith.constant 0 : i32
    %c0_i32_1 = arith.constant 0 : i32
    return %c0_i32, %c0_i32_0 : i32, i32
  }
  func.func @transform_12(%arg0: i32) -> (i32, i32) {
    %c0_i32 = arith.constant 0 : i32
    %c0_i32_0 = arith.constant 0 : i32
    %c0_i32_1 = arith.constant 0 : i32
    return %c0_i32, %c0_i32_0 : i32, i32
  }
  func.func @transform_13(%arg0: i32) -> (i32, i32) {
    %c0_i32 = arith.constant 0 : i32
    %c0_i32_0 = arith.constant 0 : i32
    %c0_i32_1 = arith.constant 0 : i32
    return %c0_i32, %c0_i32_0 : i32, i32
  }
  func.func @transform_14(%arg0: i32) -> (i32, i32) {
    %c0_i32 = arith.constant 0 : i32
    %c0_i32_0 = arith.constant 0 : i32
    %c0_i32_1 = arith.constant 0 : i32
    return %c0_i32, %c0_i32_0 : i32, i32
  }
  func.func @transform_15(%arg0: i32) -> (i32, i32) {
    %c0_i32 = arith.constant 0 : i32
    %c0_i32_0 = arith.constant 0 : i32
    %c0_i32_1 = arith.constant 0 : i32
    return %c0_i32, %c0_i32_0 : i32, i32
  }
  func.func @transform_16(%arg0: i32) -> (i32, i32) {
    %c0_i32 = arith.constant 0 : i32
    %c0_i32_0 = arith.constant 0 : i32
    %c0_i32_1 = arith.constant 0 : i32
    return %c0_i32, %c0_i32_0 : i32, i32
  }
  func.func @transform_17(%arg0: i32) -> (i32, i32) {
    %c0_i32 = arith.constant 0 : i32
    %c0_i32_0 = arith.constant 0 : i32
    %c0_i32_1 = arith.constant 0 : i32
    return %c0_i32, %c0_i32_0 : i32, i32
  }
  func.func @transform_18(%arg0: i32) -> (i32, i32) {
    %c0_i32 = arith.constant 0 : i32
    %c0_i32_0 = arith.constant 0 : i32
    %c0_i32_1 = arith.constant 0 : i32
    return %c0_i32, %c0_i32_0 : i32, i32
  }
  func.func @transform_19(%arg0: i32) -> (i32, i32) {
    %c0_i32 = arith.constant 0 : i32
    %c0_i32_0 = arith.constant 0 : i32
    %c0_i32_1 = arith.constant 0 : i32
    return %c0_i32, %c0_i32_0 : i32, i32
  }
  func.func @transform_20(%arg0: i32) -> (i32, i32) {
    %c0_i32 = arith.constant 0 : i32
    %c0_i32_0 = arith.constant 0 : i32
    return %arg0, %c0_i32 : i32, i32
  }
}

module attributes {stable_mosaic.version = 11 : i64} {
  func.func @_item_table_kernel(%arg0: i32, %arg1: memref<2x64xf32, #tpu.memory_space<vmem>>, %arg2: memref<16x32xf32, #tpu.memory_space<vmem>>, %arg3: memref<16x48xf32, #tpu.memory_space<vmem>>, %arg4: memref<16x64xf32, #tpu.memory_space<vmem>>, %arg5: memref<16x64xf32, #tpu.memory_space<vmem>>, %arg6: memref<16x1xf32, #tpu.memory_space<vmem>>, %arg7: memref<32x32xbf16, #tpu.memory_space<vmem>>, %arg8: memref<1x32xf32, #tpu.memory_space<vmem>>, %arg9: memref<32x256xbf16, #tpu.memory_space<vmem>>, %arg10: memref<1x256xf32, #tpu.memory_space<vmem>>, %arg11: memref<256x64xbf16, #tpu.memory_space<vmem>>, %arg12: memref<1x64xf32, #tpu.memory_space<vmem>>, %arg13: memref<48x48xbf16, #tpu.memory_space<vmem>>, %arg14: memref<1x48xf32, #tpu.memory_space<vmem>>, %arg15: memref<48x256xbf16, #tpu.memory_space<vmem>>, %arg16: memref<1x256xf32, #tpu.memory_space<vmem>>, %arg17: memref<256x64xbf16, #tpu.memory_space<vmem>>, %arg18: memref<1x64xf32, #tpu.memory_space<vmem>>, %arg19: memref<64x64xbf16, #tpu.memory_space<vmem>>, %arg20: memref<1x64xf32, #tpu.memory_space<vmem>>, %arg21: memref<16x192xbf16, #tpu.memory_space<vmem>>) attributes {dimension_semantics = [#tpu.dimension_semantics<parallel>], iteration_bounds = array<i64: 1>, scalar_prefetch = 0 : i64, scratch_operands = 0 : i64, tpu.core_type = #tpu.core_type<tc>, window_params = [{pipeline_mode = #tpu.pipeline_mode<synchronous>, transform_indices = @transform_0, window_bounds = array<i64: 2, 64>}, {transform_indices = @transform_1, window_bounds = array<i64: 16, 32>}, {transform_indices = @transform_2, window_bounds = array<i64: 16, 48>}, {transform_indices = @transform_3, window_bounds = array<i64: 16, 64>}, {transform_indices = @transform_4, window_bounds = array<i64: 16, 64>}, {transform_indices = @transform_5, window_bounds = array<i64: 16, 1>}, {pipeline_mode = #tpu.pipeline_mode<synchronous>, transform_indices = @transform_6, window_bounds = array<i64: 32, 32>}, {pipeline_mode = #tpu.pipeline_mode<synchronous>, transform_indices = @transform_7, window_bounds = array<i64: 1, 32>}, {pipeline_mode = #tpu.pipeline_mode<synchronous>, transform_indices = @transform_8, window_bounds = array<i64: 32, 256>}, {pipeline_mode = #tpu.pipeline_mode<synchronous>, transform_indices = @transform_9, window_bounds = array<i64: 1, 256>}, {pipeline_mode = #tpu.pipeline_mode<synchronous>, transform_indices = @transform_10, window_bounds = array<i64: 256, 64>}, {pipeline_mode = #tpu.pipeline_mode<synchronous>, transform_indices = @transform_11, window_bounds = array<i64: 1, 64>}, {pipeline_mode = #tpu.pipeline_mode<synchronous>, transform_indices = @transform_12, window_bounds = array<i64: 48, 48>}, {pipeline_mode = #tpu.pipeline_mode<synchronous>, transform_indices = @transform_13, window_bounds = array<i64: 1, 48>}, {pipeline_mode = #tpu.pipeline_mode<synchronous>, transform_indices = @transform_14, window_bounds = array<i64: 48, 256>}, {pipeline_mode = #tpu.pipeline_mode<synchronous>, transform_indices = @transform_15, window_bounds = array<i64: 1, 256>}, {pipeline_mode = #tpu.pipeline_mode<synchronous>, transform_indices = @transform_16, window_bounds = array<i64: 256, 64>}, {pipeline_mode = #tpu.pipeline_mode<synchronous>, transform_indices = @transform_17, window_bounds = array<i64: 1, 64>}, {pipeline_mode = #tpu.pipeline_mode<synchronous>, transform_indices = @transform_18, window_bounds = array<i64: 64, 64>}, {pipeline_mode = #tpu.pipeline_mode<synchronous>, transform_indices = @transform_19, window_bounds = array<i64: 1, 64>}, {transform_indices = @transform_20, window_bounds = array<i64: 16, 192>}]} {
    %c0 = arith.constant 0 : index
    %c0_0 = arith.constant 0 : index
    %0 = vector.load %arg2[%c0, %c0_0] : memref<16x32xf32, #tpu.memory_space<vmem>>, vector<16x32xf32>
    %1 = arith.truncf %0 : vector<16x32xf32> to vector<16x32xbf16>
    %c0_1 = arith.constant 0 : index
    %c0_2 = arith.constant 0 : index
    %2 = vector.load %arg7[%c0_1, %c0_2] : memref<32x32xbf16, #tpu.memory_space<vmem>>, vector<32x32xbf16>
    %cst = arith.constant dense<0.000000e+00> : vector<16x32xf32>
    %3 = tpu.matmul %1, %2, %cst {dimension_numbers = #tpu.dot_dimension_numbers<[1], [0], [0], [1], [0, 0, 1, 1], [], []>} : vector<16x32xbf16>, vector<32x32xbf16>, vector<16x32xf32> -> vector<16x32xf32>
    %c0_3 = arith.constant 0 : index
    %c0_4 = arith.constant 0 : index
    %4 = vector.load %arg8[%c0_3, %c0_4] : memref<1x32xf32, #tpu.memory_space<vmem>>, vector<1x32xf32>
    %5 = vector.broadcast %4 : vector<1x32xf32> to vector<16x32xf32>
    %6 = arith.addf %3, %5 : vector<16x32xf32>
    %cst_5 = arith.constant 0.000000e+00 : f32
    %7 = vector.broadcast %cst_5 : f32 to vector<16x32xf32>
    %8 = arith.maximumf %6, %7 : vector<16x32xf32>
    %9 = arith.truncf %8 : vector<16x32xf32> to vector<16x32xbf16>
    %c0_6 = arith.constant 0 : index
    %c0_7 = arith.constant 0 : index
    %10 = vector.load %arg9[%c0_6, %c0_7] : memref<32x256xbf16, #tpu.memory_space<vmem>>, vector<32x256xbf16>
    %cst_8 = arith.constant dense<0.000000e+00> : vector<16x256xf32>
    %11 = tpu.matmul %9, %10, %cst_8 {dimension_numbers = #tpu.dot_dimension_numbers<[1], [0], [0], [1], [0, 0, 1, 1], [], []>} : vector<16x32xbf16>, vector<32x256xbf16>, vector<16x256xf32> -> vector<16x256xf32>
    %c0_9 = arith.constant 0 : index
    %c0_10 = arith.constant 0 : index
    %12 = vector.load %arg10[%c0_9, %c0_10] : memref<1x256xf32, #tpu.memory_space<vmem>>, vector<1x256xf32>
    %13 = vector.broadcast %12 : vector<1x256xf32> to vector<16x256xf32>
    %14 = arith.addf %11, %13 : vector<16x256xf32>
    %cst_11 = arith.constant 0.000000e+00 : f32
    %15 = vector.broadcast %cst_11 : f32 to vector<16x256xf32>
    %16 = arith.maximumf %14, %15 : vector<16x256xf32>
    %17 = arith.truncf %16 : vector<16x256xf32> to vector<16x256xbf16>
    %c0_12 = arith.constant 0 : index
    %c0_13 = arith.constant 0 : index
    %18 = vector.load %arg11[%c0_12, %c0_13] : memref<256x64xbf16, #tpu.memory_space<vmem>>, vector<256x64xbf16>
    %cst_14 = arith.constant dense<0.000000e+00> : vector<16x64xf32>
    %19 = tpu.matmul %17, %18, %cst_14 {dimension_numbers = #tpu.dot_dimension_numbers<[1], [0], [0], [1], [0, 0, 1, 1], [], []>} : vector<16x256xbf16>, vector<256x64xbf16>, vector<16x64xf32> -> vector<16x64xf32>
    %c0_15 = arith.constant 0 : index
    %c0_16 = arith.constant 0 : index
    %20 = vector.load %arg12[%c0_15, %c0_16] : memref<1x64xf32, #tpu.memory_space<vmem>>, vector<1x64xf32>
    %21 = vector.broadcast %20 : vector<1x64xf32> to vector<16x64xf32>
    %22 = arith.addf %19, %21 : vector<16x64xf32>
    %c0_17 = arith.constant 0 : index
    %c0_18 = arith.constant 0 : index
    %23 = vector.load %arg3[%c0_17, %c0_18] : memref<16x48xf32, #tpu.memory_space<vmem>>, vector<16x48xf32>
    %24 = arith.truncf %23 : vector<16x48xf32> to vector<16x48xbf16>
    %c0_19 = arith.constant 0 : index
    %c0_20 = arith.constant 0 : index
    %25 = vector.load %arg13[%c0_19, %c0_20] : memref<48x48xbf16, #tpu.memory_space<vmem>>, vector<48x48xbf16>
    %cst_21 = arith.constant dense<0.000000e+00> : vector<16x48xf32>
    %26 = tpu.matmul %24, %25, %cst_21 {dimension_numbers = #tpu.dot_dimension_numbers<[1], [0], [0], [1], [0, 0, 1, 1], [], []>} : vector<16x48xbf16>, vector<48x48xbf16>, vector<16x48xf32> -> vector<16x48xf32>
    %c0_22 = arith.constant 0 : index
    %c0_23 = arith.constant 0 : index
    %27 = vector.load %arg14[%c0_22, %c0_23] : memref<1x48xf32, #tpu.memory_space<vmem>>, vector<1x48xf32>
    %28 = vector.broadcast %27 : vector<1x48xf32> to vector<16x48xf32>
    %29 = arith.addf %26, %28 : vector<16x48xf32>
    %cst_24 = arith.constant 0.000000e+00 : f32
    %30 = vector.broadcast %cst_24 : f32 to vector<16x48xf32>
    %31 = arith.maximumf %29, %30 : vector<16x48xf32>
    %32 = arith.truncf %31 : vector<16x48xf32> to vector<16x48xbf16>
    %c0_25 = arith.constant 0 : index
    %c0_26 = arith.constant 0 : index
    %33 = vector.load %arg15[%c0_25, %c0_26] : memref<48x256xbf16, #tpu.memory_space<vmem>>, vector<48x256xbf16>
    %cst_27 = arith.constant dense<0.000000e+00> : vector<16x256xf32>
    %34 = tpu.matmul %32, %33, %cst_27 {dimension_numbers = #tpu.dot_dimension_numbers<[1], [0], [0], [1], [0, 0, 1, 1], [], []>} : vector<16x48xbf16>, vector<48x256xbf16>, vector<16x256xf32> -> vector<16x256xf32>
    %c0_28 = arith.constant 0 : index
    %c0_29 = arith.constant 0 : index
    %35 = vector.load %arg16[%c0_28, %c0_29] : memref<1x256xf32, #tpu.memory_space<vmem>>, vector<1x256xf32>
    %36 = vector.broadcast %35 : vector<1x256xf32> to vector<16x256xf32>
    %37 = arith.addf %34, %36 : vector<16x256xf32>
    %cst_30 = arith.constant 0.000000e+00 : f32
    %38 = vector.broadcast %cst_30 : f32 to vector<16x256xf32>
    %39 = arith.maximumf %37, %38 : vector<16x256xf32>
    %40 = arith.truncf %39 : vector<16x256xf32> to vector<16x256xbf16>
    %c0_31 = arith.constant 0 : index
    %c0_32 = arith.constant 0 : index
    %41 = vector.load %arg17[%c0_31, %c0_32] : memref<256x64xbf16, #tpu.memory_space<vmem>>, vector<256x64xbf16>
    %cst_33 = arith.constant dense<0.000000e+00> : vector<16x64xf32>
    %42 = tpu.matmul %40, %41, %cst_33 {dimension_numbers = #tpu.dot_dimension_numbers<[1], [0], [0], [1], [0, 0, 1, 1], [], []>} : vector<16x256xbf16>, vector<256x64xbf16>, vector<16x64xf32> -> vector<16x64xf32>
    %c0_34 = arith.constant 0 : index
    %c0_35 = arith.constant 0 : index
    %43 = vector.load %arg18[%c0_34, %c0_35] : memref<1x64xf32, #tpu.memory_space<vmem>>, vector<1x64xf32>
    %44 = vector.broadcast %43 : vector<1x64xf32> to vector<16x64xf32>
    %45 = arith.addf %42, %44 : vector<16x64xf32>
    %c0_36 = arith.constant 0 : index
    %c0_37 = arith.constant 0 : index
    %46 = vector.load %arg1[%c0_36, %c0_37] : memref<2x64xf32, #tpu.memory_space<vmem>>, vector<1x64xf32>
    %47 = arith.mulf %22, %22 : vector<16x64xf32>
    %cst_38 = arith.constant dense<0.000000e+00> : vector<16xf32>
    %48 = vector.multi_reduction <add>, %47, %cst_38 [1] : vector<16x64xf32> to vector<16xf32>
    %49 = vector.shape_cast %48 : vector<16xf32> to vector<16x1xf32>
    %50 = math.sqrt %49 : vector<16x1xf32>
    %cst_39 = arith.constant 9.99999996E-13 : f32
    %51 = vector.broadcast %cst_39 : f32 to vector<16x1xf32>
    %52 = arith.maximumf %50, %51 : vector<16x1xf32>
    %53 = vector.broadcast %52 : vector<16x1xf32> to vector<16x64xf32>
    %54 = arith.divf %22, %53 : vector<16x64xf32>
    %55 = vector.broadcast %46 : vector<1x64xf32> to vector<16x64xf32>
    %56 = arith.mulf %55, %54 : vector<16x64xf32>
    %c1 = arith.constant 1 : index
    %c0_40 = arith.constant 0 : index
    %57 = vector.load %arg1[%c1, %c0_40] : memref<2x64xf32, #tpu.memory_space<vmem>>, vector<1x64xf32>
    %58 = arith.mulf %45, %45 : vector<16x64xf32>
    %cst_41 = arith.constant dense<0.000000e+00> : vector<16xf32>
    %59 = vector.multi_reduction <add>, %58, %cst_41 [1] : vector<16x64xf32> to vector<16xf32>
    %60 = vector.shape_cast %59 : vector<16xf32> to vector<16x1xf32>
    %61 = math.sqrt %60 : vector<16x1xf32>
    %cst_42 = arith.constant 9.99999996E-13 : f32
    %62 = vector.broadcast %cst_42 : f32 to vector<16x1xf32>
    %63 = arith.maximumf %61, %62 : vector<16x1xf32>
    %64 = vector.broadcast %63 : vector<16x1xf32> to vector<16x64xf32>
    %65 = arith.divf %45, %64 : vector<16x64xf32>
    %66 = vector.broadcast %57 : vector<1x64xf32> to vector<16x64xf32>
    %67 = arith.mulf %66, %65 : vector<16x64xf32>
    %68 = arith.addf %56, %67 : vector<16x64xf32>
    %c0_43 = arith.constant 0 : index
    %c0_44 = arith.constant 0 : index
    %69 = vector.load %arg4[%c0_43, %c0_44] : memref<16x64xf32, #tpu.memory_space<vmem>>, vector<16x64xf32>
    %70 = arith.truncf %69 : vector<16x64xf32> to vector<16x64xbf16>
    %c0_45 = arith.constant 0 : index
    %c0_46 = arith.constant 0 : index
    %71 = vector.load %arg19[%c0_45, %c0_46] : memref<64x64xbf16, #tpu.memory_space<vmem>>, vector<64x64xbf16>
    %cst_47 = arith.constant dense<0.000000e+00> : vector<16x64xf32>
    %72 = tpu.matmul %70, %71, %cst_47 {dimension_numbers = #tpu.dot_dimension_numbers<[1], [0], [0], [1], [0, 0, 1, 1], [], []>} : vector<16x64xbf16>, vector<64x64xbf16>, vector<16x64xf32> -> vector<16x64xf32>
    %c0_48 = arith.constant 0 : index
    %c0_49 = arith.constant 0 : index
    %73 = vector.load %arg20[%c0_48, %c0_49] : memref<1x64xf32, #tpu.memory_space<vmem>>, vector<1x64xf32>
    %74 = vector.broadcast %73 : vector<1x64xf32> to vector<16x64xf32>
    %75 = arith.addf %72, %74 : vector<16x64xf32>
    %c0_50 = arith.constant 0 : index
    %c0_51 = arith.constant 0 : index
    %76 = vector.load %arg6[%c0_50, %c0_51] : memref<16x1xf32, #tpu.memory_space<vmem>>, vector<16x1xf32>
    %cst_52 = arith.constant 5.000000e-01 : f32
    %77 = vector.broadcast %cst_52 : f32 to vector<16x1xf32>
    %78 = arith.cmpf ogt, %76, %77 : vector<16x1xf32>
    %79 = vector.shape_cast %78 : vector<16x1xi1> to vector<16x1xi1>
    %80 = vector.broadcast %79 : vector<16x1xi1> to vector<16x64xi1>
    %81 = arith.select %80, %75, %68 : vector<16x64xi1>, vector<16x64xf32>
    %82 = arith.truncf %68 : vector<16x64xf32> to vector<16x64xbf16>
    %c0_53 = arith.constant 0 : index
    %c0_54 = arith.constant 0 : index
    %83 = vector.load %arg21[%c0_53, %c0_54] : memref<16x192xbf16, #tpu.memory_space<vmem>>, vector<16x64xbf16>
    tpu.vector_store %arg21[%c0_53, %c0_54], %82 {strides = array<i32>} : memref<16x192xbf16, #tpu.memory_space<vmem>>, vector<16x64xbf16>,
    %c0_55 = arith.constant 0 : index
    %c0_56 = arith.constant 0 : index
    %84 = vector.load %arg5[%c0_55, %c0_56] : memref<16x64xf32, #tpu.memory_space<vmem>>, vector<16x64xf32>
    %85 = arith.truncf %84 : vector<16x64xf32> to vector<16x64xbf16>
    %c0_57 = arith.constant 0 : index
    %c64 = arith.constant 64 : index
    %86 = vector.load %arg21[%c0_57, %c64] : memref<16x192xbf16, #tpu.memory_space<vmem>>, vector<16x64xbf16>
    tpu.vector_store %arg21[%c0_57, %c64], %85 {strides = array<i32>} : memref<16x192xbf16, #tpu.memory_space<vmem>>, vector<16x64xbf16>,
    %87 = arith.truncf %81 : vector<16x64xf32> to vector<16x64xbf16>
    %c0_58 = arith.constant 0 : index
    %c128 = arith.constant 128 : index
    %88 = vector.load %arg21[%c0_58, %c128] : memref<16x192xbf16, #tpu.memory_space<vmem>>, vector<16x64xbf16>
    tpu.vector_store %arg21[%c0_58, %c128], %87 {strides = array<i32>} : memref<16x192xbf16, #tpu.memory_space<vmem>>, vector<16x64xbf16>,
    return
  }
  func.func @transform_0(%arg0: i32) -> (i32, i32) {
    %c0_i32 = arith.constant 0 : i32
    %c0_i32_0 = arith.constant 0 : i32
    %c0_i32_1 = arith.constant 0 : i32
    return %c0_i32, %c0_i32_0 : i32, i32
  }
  func.func @transform_1(%arg0: i32) -> (i32, i32) {
    %c0_i32 = arith.constant 0 : i32
    %c0_i32_0 = arith.constant 0 : i32
    return %arg0, %c0_i32 : i32, i32
  }
  func.func @transform_2(%arg0: i32) -> (i32, i32) {
    %c0_i32 = arith.constant 0 : i32
    %c0_i32_0 = arith.constant 0 : i32
    return %arg0, %c0_i32 : i32, i32
  }
  func.func @transform_3(%arg0: i32) -> (i32, i32) {
    %c0_i32 = arith.constant 0 : i32
    %c0_i32_0 = arith.constant 0 : i32
    return %arg0, %c0_i32 : i32, i32
  }
  func.func @transform_4(%arg0: i32) -> (i32, i32) {
    %c0_i32 = arith.constant 0 : i32
    %c0_i32_0 = arith.constant 0 : i32
    return %arg0, %c0_i32 : i32, i32
  }
  func.func @transform_5(%arg0: i32) -> (i32, i32) {
    %c0_i32 = arith.constant 0 : i32
    %c0_i32_0 = arith.constant 0 : i32
    return %arg0, %c0_i32 : i32, i32
  }
  func.func @transform_6(%arg0: i32) -> (i32, i32) {
    %c0_i32 = arith.constant 0 : i32
    %c0_i32_0 = arith.constant 0 : i32
    %c0_i32_1 = arith.constant 0 : i32
    return %c0_i32, %c0_i32_0 : i32, i32
  }
  func.func @transform_7(%arg0: i32) -> (i32, i32) {
    %c0_i32 = arith.constant 0 : i32
    %c0_i32_0 = arith.constant 0 : i32
    %c0_i32_1 = arith.constant 0 : i32
    return %c0_i32, %c0_i32_0 : i32, i32
  }
  func.func @transform_8(%arg0: i32) -> (i32, i32) {
    %c0_i32 = arith.constant 0 : i32
    %c0_i32_0 = arith.constant 0 : i32
    %c0_i32_1 = arith.constant 0 : i32
    return %c0_i32, %c0_i32_0 : i32, i32
  }
  func.func @transform_9(%arg0: i32) -> (i32, i32) {
    %c0_i32 = arith.constant 0 : i32
    %c0_i32_0 = arith.constant 0 : i32
    %c0_i32_1 = arith.constant 0 : i32
    return %c0_i32, %c0_i32_0 : i32, i32
  }
  func.func @transform_10(%arg0: i32) -> (i32, i32) {
    %c0_i32 = arith.constant 0 : i32
    %c0_i32_0 = arith.constant 0 : i32
    %c0_i32_1 = arith.constant 0 : i32
    return %c0_i32, %c0_i32_0 : i32, i32
  }
  func.func @transform_11(%arg0: i32) -> (i32, i32) {
    %c0_i32 = arith.constant 0 : i32
    %c0_i32_0 = arith.constant 0 : i32
    %c0_i32_1 = arith.constant 0 : i32
    return %c0_i32, %c0_i32_0 : i32, i32
  }
  func.func @transform_12(%arg0: i32) -> (i32, i32) {
    %c0_i32 = arith.constant 0 : i32
    %c0_i32_0 = arith.constant 0 : i32
    %c0_i32_1 = arith.constant 0 : i32
    return %c0_i32, %c0_i32_0 : i32, i32
  }
  func.func @transform_13(%arg0: i32) -> (i32, i32) {
    %c0_i32 = arith.constant 0 : i32
    %c0_i32_0 = arith.constant 0 : i32
    %c0_i32_1 = arith.constant 0 : i32
    return %c0_i32, %c0_i32_0 : i32, i32
  }
  func.func @transform_14(%arg0: i32) -> (i32, i32) {
    %c0_i32 = arith.constant 0 : i32
    %c0_i32_0 = arith.constant 0 : i32
    %c0_i32_1 = arith.constant 0 : i32
    return %c0_i32, %c0_i32_0 : i32, i32
  }
  func.func @transform_15(%arg0: i32) -> (i32, i32) {
    %c0_i32 = arith.constant 0 : i32
    %c0_i32_0 = arith.constant 0 : i32
    %c0_i32_1 = arith.constant 0 : i32
    return %c0_i32, %c0_i32_0 : i32, i32
  }
  func.func @transform_16(%arg0: i32) -> (i32, i32) {
    %c0_i32 = arith.constant 0 : i32
    %c0_i32_0 = arith.constant 0 : i32
    %c0_i32_1 = arith.constant 0 : i32
    return %c0_i32, %c0_i32_0 : i32, i32
  }
  func.func @transform_17(%arg0: i32) -> (i32, i32) {
    %c0_i32 = arith.constant 0 : i32
    %c0_i32_0 = arith.constant 0 : i32
    %c0_i32_1 = arith.constant 0 : i32
    return %c0_i32, %c0_i32_0 : i32, i32
  }
  func.func @transform_18(%arg0: i32) -> (i32, i32) {
    %c0_i32 = arith.constant 0 : i32
    %c0_i32_0 = arith.constant 0 : i32
    %c0_i32_1 = arith.constant 0 : i32
    return %c0_i32, %c0_i32_0 : i32, i32
  }
  func.func @transform_19(%arg0: i32) -> (i32, i32) {
    %c0_i32 = arith.constant 0 : i32
    %c0_i32_0 = arith.constant 0 : i32
    %c0_i32_1 = arith.constant 0 : i32
    return %c0_i32, %c0_i32_0 : i32, i32
  }
  func.func @transform_20(%arg0: i32) -> (i32, i32) {
    %c0_i32 = arith.constant 0 : i32
    %c0_i32_0 = arith.constant 0 : i32
    return %arg0, %c0_i32 : i32, i32
  }
}

</mosaic_0001>

<bundles_post_ra>
// kernel: tpu_custom_call.1
= control target key start
LH: loop header
LB: loop body
LE: loop exit
PB: predicated region body
PF: predicated region fallthrough
CT: control target
= control target key end

     0   :  { %s1663_s0 = inlined_call_operand.vmem [shape: f32[2,64], index: 0, kind: input, shape index: {}]   ;;  %s1664_s1 = inlined_call_operand.vmem [shape: f32[16,32], index: 1, kind: input, shape index: {}]   ;;  %s1665_s2 = inlined_call_operand.vmem [shape: f32[16,48], index: 2, kind: input, shape index: {}]   ;;  %s1666_s3 = inlined_call_operand.vmem [shape: f32[16,64], index: 3, kind: input, shape index: {}]   ;;  %s1667_s4 = inlined_call_operand.vmem [shape: f32[16,64], index: 4, kind: input, shape index: {}]   ;;  %s1668_s5 = inlined_call_operand.vmem [shape: f32[16,1], index: 5, kind: input, shape index: {}]   ;;  %s1669_s6 = inlined_call_operand.vmem [shape: bf16[32,32], index: 6, kind: input, shape index: {}]   ;;  %s1670_s7 = inlined_call_operand.vmem [shape: f32[1,32], index: 7, kind: input, shape index: {}]   ;;  %s1671_s8 = inlined_call_operand.vmem [shape: bf16[32,256], index: 8, kind: input, shape index: {}]   ;;  %s1672_s9 = inlined_call_operand.vmem [shape: f32[1,256], index: 9, kind: input, shape index: {}]   ;;  %s1673_s10 = inlined_call_operand.vmem [shape: bf16[256,64], index: 10, kind: input, shape index: {}]   ;;  %s1674_s11 = inlined_call_operand.vmem [shape: f32[1,64], index: 11, kind: input, shape index: {}]   ;;  %s1675_s12 = inlined_call_operand.vmem [shape: bf16[48,48], index: 12, kind: input, shape index: {}]   ;;  %s1676_s13 = inlined_call_operand.vmem [shape: f32[1,48], index: 13, kind: input, shape index: {}]   ;;  %s1677_s14 = inlined_call_operand.vmem [shape: bf16[48,256], index: 14, kind: input, shape index: {}]   ;;  %s1678_s15 = inlined_call_operand.vmem [shape: f32[1,256], index: 15, kind: input, shape index: {}]   ;;  %s1679_s16 = inlined_call_operand.vmem [shape: bf16[256,64], index: 16, kind: input, shape index: {}]   ;;  %s1680_s17 = inlined_call_operand.vmem [shape: f32[1,64], index: 17, kind: input, shape index: {}]   ;;  %s1681_s18 = inlined_call_operand.vmem [shape: bf16[64,64], index: 18, kind: input, shape index: {}]   ;;  %s1682_s19 = inlined_call_operand.vmem [shape: f32[1,64], index: 19, kind: input, shape index: {}]   ;;  %s1683_s20 = inlined_call_operand.hbm [shape: bf16[16,192], index: 20, kind: output, shape index: {}]  }
   0x1   :  { %1689 = sst [smem:[#allocation5_spill]] %s1663_s0 }
   0x2   :  { %1690 = sst [smem:[#allocation6_spill]] %s1664_s1 }
   0x3   :  { %1691 = sst [smem:[#allocation7_spill]] %s1665_s2 }
   0x4   :  { %1692 = sst [smem:[#allocation8_spill]] %s1666_s3 }
   0x5   :  { %1693 = sst [smem:[#allocation9_spill]] %s1667_s4 }
   0x6   :  { %v1162_v0 = vld [vmem:[%s1669_s6] sm:$0xff]   ;;  %v1258_v1 = vmov 0.0   ;;  %v1163_v2 = vld [vmem:[%s1669_s6 + $0x8] sm:$0xff]   ;;  %vm1259_vm0 = vmmov 0   ;;  %s1694_s3 = sld [smem:[#allocation6_spill]]  ;;  %vm93_vm1 = vcmask 261120  }
   0x7   :  { %1123 = vmatprep.subr.bf16.mxu0 %v1258_v1  ;;  %1127 = vmatprep.mubr.msk.bf16.mxu0 %vm1259_vm0, %v1258_v1 }
   0x8   :  { %1124 = vmatpush3.bf16.msra.mxu0 %v1162_v0 }
   0x9   :  { %1125 = vmatprep.subr.bf16.mxu0 %v1258_v1 }
   0xc   :  { %v67_v3 = vld [vmem:[%s1694_s3] sm:$0xff]  ;;  %v68_v4 = vld [vmem:[%s1694_s3 + $0x8] sm:$0xff]  ;;  %1126 = vmatpush3.bf16.msra.mxu0 %v1163_v2 }
   0xd   :  { %v69_v5 = vpack.c.bf16 %v68_v4, %v67_v3 }
   0xf   :  { %1128 = vmatmul.mubr.msk.bf16.vlgmr.msra.gmra.mrb[0].mxu0 %vm93_vm1, %v69_v5 }
  0x10   :  { %25 = vsyncpa [#allocation3], 0  ;;  %v1164_v6 = vld [vmem:[%s1671_s8 + $0x4] ss:$8 sps:$4 sm:$0xff]   ;;  %v1166_v7 = vld [vmem:[%s1671_s8] ss:$8 sps:$4 sm:$0xff]   ;;  %v147_v50 = vlaneseq }
  0x11   :  { %180 = vmatprep.subr.bf16.mxu1 %v1164_v6  ;;  %v1167_v8 = vld [vmem:[%s1671_s8 + $0x14] ss:$8 sps:$4 sm:$0xff]   ;;  %v1169_v9 = vld [vmem:[%s1671_s8 + $0x10] ss:$8 sps:$4 sm:$0xff]   ;;  %v1260_v10 = vmov 0   ;;  %v1173_v11 = vld [vmem:[%s1673_s10 + $0x40] sm:$0xff]  }
  0x12   :  { %181 = vmatpush1.bf16.msra.mxu1 %v1166_v7  ;;  %212 = vmatprep.mubr.bf16.mxu1 %v1260_v10  ;;  %v1174_v12 = vld [vmem:[%s1673_s10] sm:$0xff]   ;;  %v1175_v13 = vld [vmem:[%s1673_s10 + $0x48] sm:$0xff]   ;;  %v1177_v15 = vld [vmem:[%s1673_s10 + $0x50] sm:$0xff]   ;;  %s1695_s0 = sld [smem:[#allocation7_spill]]  ;;  %vm439_vm2 = vcmask 392192   ;;  %v1498_v51 = vshrl.u32 %v147_v50, 7 }
  0x13   :  { %182 = vmatprep.subr.bf16.mxu1 %v1167_v8  ;;  %1161 = vset.pattern.permute.xlu1 %v1260_v10  ;;  %v1176_v14 = vld [vmem:[%s1673_s10 + $0x8] sm:$0xff]   ;;  %v1178_v16 = vld [vmem:[%s1673_s10 + $0x10] sm:$0xff]   ;;  %v1179_v17 = vld [vmem:[%s1673_s10 + $0x58] sm:$0xff]   ;;  %vm766_vm3 = vcmask 523264   ;;  %s1696_s24 = sld [smem:[#allocation8_spill]]  ;;  %vm946_vm15 = vcmask 519168  }
  0x14   :  { %1160 = vset.pattern.permute.xlu0 %v1260_v10  ;;  %1070 = vmatprep.subr.bf16.mxu0 %v1173_v11  ;;  %v1180_v18 = vld [vmem:[%s1673_s10 + $0x18] sm:$0xff]   ;;  %v1181_v19 = vld [vmem:[%s1673_s10 + $0x60] sm:$0xff]   ;;  %v1183_v21 = vld [vmem:[%s1673_s10 + $0x68] sm:$0xff]   ;;  %v149_v52 = vsub.s32 0, %v1498_v51  ;;  %v153_v54 = vsub.s32 1, %v1498_v51 }
  0x15   :  { %1071 = vmatpush3.bf16.msra.mxu0 %v1174_v12  ;;  %v1182_v20 = vld [vmem:[%s1673_s10 + $0x20] sm:$0xff]   ;;  %v1171_v33 = vld [vmem:[%s1675_s12 + $0x8] sm:$0xff]   ;;  %v1172_v34 = vld [vmem:[%s1675_s12 + $0x10] sm:$0xff]  }
  0x16   :  { %183 = vmatpush1.bf16.msra.mxu1 %v1169_v9  ;;  %1072 = vmatprep.subr.bf16.mxu0 %v1175_v13  ;;  %v992_v22 = vld [vmem:[%s1670_s7] ss:$0 sm:$0xff]  ;;  %v1184_v38 = vld [vmem:[%s1673_s10 + $0x28] sm:$0xff]   ;;  %v1185_v39 = vld [vmem:[%s1673_s10 + $0x70] sm:$0xff]   ;;  %s1261_s7 = smov 64  }
  0x17   :  { %1131 = vmatprep.subr.bf16.mxu1 %v1258_v1  ;;  %v1170_v31 = vld [vmem:[%s1675_s12] sm:$0xff]   ;;  %v1186_v40 = vld [vmem:[%s1673_s10 + $0x30] sm:$0xff]   ;;  %v1187_v41 = vld [vmem:[%s1673_s10 + $0x78] sm:$0xff]  }
  0x18   :  { %v405_v35 = vld [vmem:[%s1695_s0] sm:$0xff]  ;;  %v406_v36 = vld [vmem:[%s1695_s0 + $0x8] sm:$0xff]  ;;  %v1188_v42 = vld [vmem:[%s1673_s10 + $0x38] sm:$0xff]  }
  0x19   :  { %1073 = vmatpush3.bf16.msra.mxu0 %v1176_v14  ;;  %v407_v37 = vpack.c.bf16 %v406_v36, %v405_v35  ;;  %v1191_v43 = vld [vmem:[%s1677_s14 + $0x4] ss:$8 sps:$4 sm:$0xff]   ;;  %v1189_v44 = vld [vmem:[%s1677_s14] ss:$8 sps:$4 sm:$0xff]   ;;  %v1194_v45 = vld [vmem:[%s1677_s14 + $0x14] ss:$8 sps:$4 sm:$0xff]  }
  0x1a   :  { %1074 = vmatprep.subr.bf16.mxu0 %v1177_v15  ;;  %v1192_v46 = vld [vmem:[%s1677_s14 + $0x10] ss:$8 sps:$4 sm:$0xff]   ;;  %v1197_v47 = vld [vmem:[%s1677_s14 + $0x24] ss:$8 sps:$4 sm:$0xff]   ;;  %v1195_v48 = vld [vmem:[%s1677_s14 + $0x20] ss:$8 sps:$4 sm:$0xff]  }
  0x1b   :  { %v1198_v49 = vld [vmem:[%s1679_s16 + $0x40] sm:$0xff]  }
  0x1c   :  { %v145_v53 = vld [vmem:[%s1672_s9] sm:$0x3] }
  0x1d   :  { %1075 = vmatpush3.bf16.msra.mxu0 %v1178_v16  ;;  %v150_v55 = vrot.slane %v145_v53, %v149_v52  ;;  %v154_v56 = vrot.slane %v145_v53, %v153_v54  ;;  %v1018_v8 = vld [vmem:[%s1676_s13] ss:$0 sm:$0xff]  ;;  %s1697_s13 = sld [smem:[#allocation9_spill]] }
  0x1e   :  { %1076 = vmatprep.subr.bf16.mxu0 %v1179_v17  ;;  %v1001_v35 = vld [vmem:[%s1674_s11] ss:$0 sm:$0xff]  ;;  %s1698_s11 = sld [smem:[#allocation5_spill]] }
  0x21   :  { %1077 = vmatpush3.bf16.msra.mxu0 %v1180_v18  ;;  %v1199_v18 = vld [vmem:[%s1679_s16] sm:$0xff]  }
  0x22   :  { %1078 = vmatprep.subr.bf16.mxu0 %v1181_v19 }
  0x25   :  { %1079 = vmatpush3.bf16.msra.mxu0 %v1182_v20  ;;  %v1200_v20 = vld [vmem:[%s1679_s16 + $0x48] sm:$0xff]  }
  0x26   :  { %1080 = vmatprep.subr.bf16.mxu0 %v1183_v21  ;;  %v1201_v21 = vld [vmem:[%s1679_s16 + $0x8] sm:$0xff]  }
  0x29   :  { %1081 = vmatpush3.bf16.msra.mxu0 %v1184_v38 }
  0x2a   :  { %1082 = vmatprep.subr.bf16.mxu0 %v1185_v39 }
  0x2d   :  { %1083 = vmatpush3.bf16.msra.mxu0 %v1186_v40 }
  0x2e   :  { %1084 = vmatprep.subr.bf16.mxu0 %v1187_v41 }
  0x31   :  { %1085 = vmatpush3.bf16.msra.mxu0 %v1188_v42  ;;  %v493_v42 = vld [vmem:[%s1678_s15] sm:$0x3] }
  0x32   :  { %1141 = vmatprep.subr.bf16.mxu0 %v1258_v1 }
  0xe2   :  { %v131_v23 = vpop.f32.mrb[0].mxu0 }
  0xe3   :  { %v132_v24 = vadd.f32 %v992_v22, %v131_v23  ;;  %v1129_v25 = vpop.f32.mrb[1].mxu0  ;;  %v1203_v23 = vld [vmem:[%s1679_s16 + $0x10] sm:$0xff]  }
  0xe4   :  { %v134_v26 = vpop.f32.mrb[2].mxu0  ;;  %v1205_v25 = vld [vmem:[%s1679_s16 + $0x18] sm:$0xff]  }
  0xe5   :  { %v135_v27 = vadd.f32 %v992_v22, %v134_v26  ;;  %v1130_v28 = vpop.f32.mrb[3].mxu0  ;;  %v138_v29 = vmax.f32 %v132_v24, 0.0  ;;  %v1202_v22 = vld [vmem:[%s1679_s16 + $0x50] sm:$0xff]   ;;  %v1204_v24 = vld [vmem:[%s1679_s16 + $0x58] sm:$0xff]   ;;  %v1206_v26 = vld [vmem:[%s1679_s16 + $0x60] sm:$0xff]  }
  0xe6   :  { %v1208_v28 = vld [vmem:[%s1679_s16 + $0x68] sm:$0xff]  }
  0xe7   :  { %v139_v30 = vmax.f32 %v135_v27, 0.0  ;;  %v1207_v27 = vld [vmem:[%s1679_s16 + $0x20] sm:$0xff]  }
  0xe9   :  { %v140_v32 = vpack.c.bf16 %v139_v30, %v138_v29  ;;  %v1209_v29 = vld [vmem:[%s1679_s16 + $0x28] sm:$0xff]   ;;  %v1210_v30 = vld [vmem:[%s1679_s16 + $0x70] sm:$0xff]  }
  0xeb   :  { %1000 = vmatmul.mubr.msk.bf16.vlgmr.msra.gmra.mrb[0].mxu1 %vm93_vm1, %v140_v32  ;;  %v1212_v32 = vld [vmem:[%s1679_s16 + $0x78] sm:$0xff]  }
  0xec   :  { %1132 = vmatpush3.bf16.msra.mxu1 %v1170_v31  ;;  %1137 = vmatprep.mubr.msk.bf16.mxu1 %vm1259_vm0, %v1258_v1  ;;  %v1211_v31 = vld [vmem:[%s1679_s16 + $0x30] sm:$0xff]  }
  0xed   :  { %1133 = vmatprep.subr.bf16.mxu1 %v1258_v1 }
  0xf0   :  { %1134 = vmatpush3.bf16.msra.mxu1 %v1171_v33  ;;  %v1213_v33 = vld [vmem:[%s1679_s16 + $0x38] sm:$0xff]  }
  0xf1   :  { %1135 = vmatprep.subr.bf16.mxu1 %v1258_v1 }
  0xf4   :  { %1136 = vmatpush3.bf16.msra.mxu1 %v1172_v34 }
  0xf5   :  { %538 = vmatprep.subr.bf16.mxu1 %v1191_v43 }
  0xf7   :  { %1138 = vmatmul.mubr.msk.bf16.vlgmr.msra.gmra.mrb[4].mxu1 %vm439_vm2, %v407_v37 }
  0xf8   :  { %570 = vmatprep.mubr.bf16.mxu1 %v1260_v10  ;;  %539 = vmatpush1.bf16.msra.mxu1 %v1189_v44 }
  0xf9   :  { %540 = vmatprep.subr.bf16.mxu1 %v1194_v45  ;;  %v498_v45 = vrot.slane %v493_v42, %v149_v52 }
  0xfc   :  { %541 = vmatpush1.bf16.msra.mxu1 %v1192_v46 }
  0xfd   :  { %542 = vmatprep.subr.bf16.mxu1 %v1197_v47  ;;  %v502_v47 = vrot.slane %v493_v42, %v153_v54 }
 0x100   :  { %543 = vmatpush1.bf16.msra.mxu1 %v1195_v48 }
 0x101   :  { %1096 = vmatprep.subr.bf16.mxu1 %v1198_v49 }
 0x1be   :  { %v214_v57 = vpop.f32.mrb[0].mxu1 }
 0x1bf   :  { %v215_v58 = vadd.f32 %v214_v57, %v150_v55  ;;  %v216_v59 = vpop.f32.mrb[1].mxu1 }
 0x1c0   :  { %v217_v60 = vadd.f32 %v216_v59, %v154_v56  ;;  %v218_v61 = vpop.f32.mrb[2].mxu1 }
 0x1c1   :  { %v219_v62 = vadd.f32 %v218_v61, %v150_v55  ;;  %v220_v63 = vpop.f32.mrb[3].mxu1  ;;  %v223_v2 = vmax.f32 %v215_v58, 0.0 }
 0x1c2   :  { %v221_v0 = vadd.f32 %v220_v63, %v154_v56  ;;  %v224_v4 = vmax.f32 %v217_v60, 0.0 }
 0x1c3   :  { %v225_v3 = vmax.f32 %v219_v62, 0.0 }
 0x1c4   :  { %v226_v5 = vmax.f32 %v221_v0, 0.0  ;;  %v1214_v0 = vld [vmem:[%s1681_s18] sm:$0xff]  }
 0x1c5   :  { %v227_v6 = vpack.c.bf16 %v225_v3, %v223_v2  ;;  %v1215_v2 = vld [vmem:[%s1681_s18 + $0x8] sm:$0xff]   ;;  %v1216_v3 = vld [vmem:[%s1681_s18 + $0x10] sm:$0xff]  }
 0x1c6   :  { %v228_v7 = vpack.c.bf16 %v226_v5, %v224_v4  ;;  %v1217_v4 = vld [vmem:[%s1681_s18 + $0x18] sm:$0xff]   ;;  %v836_v5 = vld [vmem:[%s1696_s24] sm:$0xff] }
 0x1c8   :  { %396 = vmatprep.mubr.bf16.mxu0 %v228_v7 }
 0x1c9   :  { %397 = vmatmul.mubr.bf16.vlgmr.msra.gmra.mrb[4].mxu0 %v227_v6  ;;  %v837_v6 = vld [vmem:[%s1696_s24 + $0x8] sm:$0xff] }
 0x1ca   :  { %v477_v9 = vpop.f32.mrb[4].mxu1  ;;  %1149 = vmatprep.mubr.msk.bf16.mxu0 %vm1259_vm0, %v1258_v1  ;;  %1142 = vmatpush3.bf16.msra.mxu0 %v1214_v0  ;;  %v838_v7 = vpack.c.bf16 %v837_v6, %v836_v5  ;;  %v1047_v5 = vld [vmem:[%s1698_s11] ss:$0 sm:$0xff]  ;;  %v1048_v6 = vld [vmem:[%s1698_s11 + $0x1] ss:$0 sm:$0xff]  ;;  %vm963_vm0 = vcmask 1043968  }
 0x1cb   :  { %v478_v11 = vadd.f32 %v1018_v8, %v477_v9  ;;  %v1139_v12 = vpop.f32.mrb[5].mxu1  ;;  %1143 = vmatprep.subr.bf16.mxu0 %v1258_v1 }
 0x1cc   :  { %v480_v13 = vpop.f32.mrb[6].mxu1  ;;  %v1030_v12 = vld [vmem:[%s1680_s17] ss:$0 sm:$0xff] }
 0x1cd   :  { %v481_v14 = vadd.f32 %v1018_v8, %v480_v13  ;;  %v1140_v15 = vpop.f32.mrb[7].mxu1  ;;  %v484_v16 = vmax.f32 %v478_v11, 0.0  ;;  %v922_v8 = vld [vmem:[%s1668_s5] sm:$0xff] }
 0x1ce   :  { %1144 = vmatpush3.bf16.msra.mxu0 %v1215_v2  ;;  %vm924_vm4 = vcmp.gt.f32.partialorder %v922_v8, 0.5 }
 0x1cf   :  { %v485_v17 = vmax.f32 %v481_v14, 0.0  ;;  %1145 = vmatprep.subr.bf16.mxu0 %v1258_v1  ;;  %v926_v9 = vsel %vm924_vm4, 1, %v1260_v10 }
 0x1d1   :  { %v486_v19 = vpack.c.bf16 %v485_v17, %v484_v16 }
 0x1d2   :  { %1146 = vmatpush3.bf16.msra.mxu0 %v1216_v3 }
 0x1d3   :  { %1029 = vmatmul.mubr.msk.bf16.vlgmr.msra.gmra.mrb[8].mxu1 %vm439_vm2, %v486_v19  ;;  %1147 = vmatprep.subr.bf16.mxu0 %v1258_v1 }
 0x1d4   :  { %1097 = vmatpush3.bf16.msra.mxu1 %v1199_v18 }
 0x1d5   :  { %1098 = vmatprep.subr.bf16.mxu1 %v1200_v20 }
 0x1d6   :  { %1148 = vmatpush3.bf16.msra.mxu0 %v1217_v4  ;;  %v1049_v4 = vld [vmem:[%s1682_s19] ss:$0 sm:$0xff]  ;;  %s1262_s19 = smov [#allocation2]  }
 0x1d7   :  { %s981_s0 = sshll.u32 %s1262_s19, 4  ;;  %s982_s0 = int_to_ptr.vmem [resolvable:$true] %s981_s0 }
 0x1d8   :  { %1099 = vmatpush3.bf16.msra.mxu1 %v1201_v21  ;;  %s1234_s10 = scalar_lea.vmem %s982_s0, 256  ;;  %p1239_p1 = scmp.lt.s32.totalorder %s982_s0, %s982_s0 }
 0x1d9   :  { %1100 = vmatprep.subr.bf16.mxu1 %v1202_v22  ;;  %1150 = vmatmul.mubr.msk.bf16.vlgmr.msra.gmra.mrb[8].mxu0 %vm766_vm3, %v838_v7  ;;  %p1235_p0 = scmp.ne.s32.totalorder %s982_s0, %s1234_s10  ;;  %p1240_p2 = scmp.lt.s32.totalorder %s1234_s10, %s1234_s10 }
 0x1db   :  { %p1241_p3 = por %p1240_p2, %p1239_p1 }
 0x1dc   :  { %1101 = vmatpush3.bf16.msra.mxu1 %v1203_v23  ;;  %v923_v23 = vld [vmem:[%s1668_s5 + $0x8] sm:$0xff] }
 0x1dd   :  { %1102 = vmatprep.subr.bf16.mxu1 %v1204_v24  ;;  %vm925_vm5 = vcmp.gt.f32.partialorder %v923_v23, 0.5  ;;  %p1242_p4 = pnand %p1241_p3, %p1235_p0 }
 0x1de   :  { %v927_v24 = vsel %vm925_vm5, 1, %v1260_v10 }
 0x1e0   :  { %1103 = vmatpush3.bf16.msra.mxu1 %v1205_v25  ;;  %v949_v25 = vld [vmem:[%s1697_s13] sm:$0xff] }
 0x1e1   :  { %1104 = vmatprep.subr.bf16.mxu1 %v1206_v26  ;;  %v1063_v26 = vpack.c.bf16 %v949_v25, %v949_v25 }
 0x1e4   :  { %1105 = vmatpush3.bf16.msra.mxu1 %v1207_v27  ;;  %v950_v27 = vld [vmem:[%s1697_s13 + $0x8] sm:$0xff] }
 0x1e5   :  { %1106 = vmatprep.subr.bf16.mxu1 %v1208_v28  ;;  %v1064_v28 = vpack.c.bf16 %v950_v27, %v950_v27 }
 0x1e8   :  { %1107 = vmatpush3.bf16.msra.mxu1 %v1209_v29 }
 0x1e9   :  { %1108 = vmatprep.subr.bf16.mxu1 %v1210_v30 }
 0x1ec   :  { %1109 = vmatpush3.bf16.msra.mxu1 %v1211_v31 }
 0x1ed   :  { %1110 = vmatprep.subr.bf16.mxu1 %v1212_v32 }
 0x1f0   :  { %1111 = vmatpush3.bf16.msra.mxu1 %v1213_v33 }
 0x29c   :  { %v1086_v34 = vpop.f32.mrb[4].mxu0 }
 0x29d   :  { %v1087_v36 = vpop.f32.mrb[5].mxu0 }
 0x29e   :  { %v1088_v37 = vadd.f32 %v1087_v36, %v1086_v34  ;;  %v1089_v38 = vpop.f32.mrb[6].mxu0 }
 0x29f   :  { %v1090_v39 = vpop.f32.mrb[7].mxu0 }
 0x2a0   :  { %v1563_v40 = vadd.f32 %v1088_v37, %v1001_v35  ;;  %v1091_v41 = vadd.f32 %v1090_v39, %v1089_v38 }
 0x2a2   :  { %v1568_v43 = vadd.f32 %v1091_v41, %v1001_v35  ;;  %v764_v44 = vmul.f32 %v1563_v40, %v1563_v40 }
 0x2a4   :  { %v767_v46 = vsel %vm766_vm3, %v764_v44, 0.0  ;;  %v765_v48 = vmul.f32 %v1568_v43, %v1568_v43 }
 0x2a5   :  { %768 = vadd.xlane.f32.xlu0 %v767_v46 }
 0x2a6   :  { %v572_v49 = vpop.f32.mrb[8].mxu1  ;;  %v770_v57 = vsel %vm766_vm3, %v765_v48, 0.0 }
 0x2a7   :  { %v573_v50 = vadd.f32 %v572_v49, %v498_v45  ;;  %v574_v53 = vpop.f32.mrb[9].mxu1 }
 0x2a8   :  { %v575_v55 = vadd.f32 %v574_v53, %v502_v47  ;;  %v576_v56 = vpop.f32.mrb[10].mxu1 }
 0x2a9   :  { %v577_v58 = vadd.f32 %v576_v56, %v498_v45  ;;  %v578_v59 = vpop.f32.mrb[11].mxu1  ;;  %771 = vadd.xlane.f32.xlu0 %v770_v57  ;;  %v581_v60 = vmax.f32 %v573_v50, 0.0 }
 0x2aa   :  { %v579_v52 = vadd.f32 %v578_v59, %v502_v47  ;;  %v582_v62 = vmax.f32 %v575_v55, 0.0 }
 0x2ab   :  { %v583_v61 = vmax.f32 %v577_v58, 0.0 }
 0x2ac   :  { %v584_v51 = vmax.f32 %v579_v52, 0.0  ;;  %v915_v29 = vpop.f32.mrb[8].mxu0 }
 0x2ad   :  { %v585_v54 = vpack.c.bf16 %v583_v61, %v581_v60  ;;  %v1151_v30 = vpop.f32.mrb[9].mxu0 }
 0x2ae   :  { %v586_v63 = vpack.c.bf16 %v584_v51, %v582_v62  ;;  %v1629_v31 = vpop.f32.mrb[10].mxu0 }
 0x2af   :  { %v1152_v32 = vpop.f32.mrb[11].mxu0 }
 0x2b0   :  { %754 = vmatprep.mubr.bf16.mxu1 %v586_v63 }
 0x2b1   :  { %755 = vmatmul.mubr.bf16.vlgmr.msra.gmra.mrb[12].mxu1 %v585_v54 }
 0x2bf   :  { %929 = vperm.xlu0 %1160, %v926_v9  }
 0x332   :  { %v769_v10 = vpop.xlane.xlu0 %768 }
 0x333   :  { %1218 = vrsqrt.f32 %v769_v10  ;;  %vm775_vm6 = vcmp.eq.f32.partialorder %v769_v10, inf  ;;  %v778_v42 = vand.u32 2147483648, %v769_v10  ;;  %vm777_vm7 = vcmp.eq.f32.partialorder %v769_v10, 0.0 }
 0x336   :  { %v772_v33 = vpop.xlane.xlu0 %771 }
 0x337   :  { %1220 = vrsqrt.f32 %v772_v33  ;;  %vm782_vm8 = vcmp.eq.f32.partialorder %v772_v33, inf  ;;  %v785_v46 = vand.u32 2147483648, %v772_v33  ;;  %vm784_vm9 = vcmp.eq.f32.partialorder %v772_v33, 0.0 }
 0x33d   :  { %v1219_v34 = vpop.eup %1218 }
 0x33e   :  { %v774_v36 = vmul.f32 %v1219_v34, %v769_v10  ;;  %v930_v8 = vpop.permute.xlu0 %929 }
 0x33f   :  { %vm934_vm14 = vcmp.eq.s32.totalorder %v930_v8, 1 }
 0x340   :  { %v776_v39 = vsel %vm775_vm6, %v769_v10, %v774_v36 }
 0x341   :  { %v1221_v35 = vpop.eup %1220  ;;  %v779_v44 = vsel %vm777_vm7, %v778_v42, %v776_v39 }
 0x342   :  { %v781_v38 = vmul.f32 %v1221_v35, %v772_v33  ;;  %v787_v47 = vmax.f32 %v779_v44, 1e-12 }
 0x344   :  { %v783_v45 = vsel %vm782_vm8, %v772_v33, %v781_v38 }
 0x345   :  { %v786_v48 = vsel %vm784_vm9, %v785_v46, %v783_v45 }
 0x346   :  { %v788_v53 = vmax.f32 %v786_v48, 1e-12 }
 0x384   :  { %v1112_v11 = vpop.f32.mrb[12].mxu1 }
 0x385   :  { %v1113_v13 = vpop.f32.mrb[13].mxu1 }
 0x386   :  { %v1114_v14 = vadd.f32 %v1113_v13, %v1112_v11  ;;  %v1115_v1 = vpop.f32.mrb[14].mxu1  ;;  %v916_v11 = vadd.f32 %v1049_v4, %v915_v29 }
 0x387   :  { %v1116_v15 = vpop.f32.mrb[15].mxu1 }
 0x388   :  { %v1609_v16 = vadd.f32 %v1114_v14, %v1030_v12  ;;  %v1117_v17 = vadd.f32 %v1116_v15, %v1115_v1 }
 0x38a   :  { %v1611_v18 = vadd.f32 %v1117_v17, %v1030_v12  ;;  %v800_v19 = vmul.f32 %v1609_v16, %v1609_v16 }
 0x38c   :  { %v802_v20 = vsel %vm766_vm3, %v800_v19, 0.0  ;;  %v801_v21 = vmul.f32 %v1611_v18, %v1611_v18 }
 0x38d   :  { %803 = vadd.xlane.f32.xlu1 %v802_v20 }
 0x38e   :  { %v805_v22 = vsel %vm766_vm3, %v801_v21, 0.0 }
 0x391   :  { %806 = vadd.xlane.f32.xlu1 %v805_v22 }
 0x3a2   :  { %932 = vperm.xlu1 %1161, %v927_v24  }
 0x3a6   :  { %957 = vrot.lane.b32.xlu1 %v1063_v26, %s1261_s7 }
 0x3aa   :  { %959 = vrot.lane.b32.xlu1 %v1064_v28, %s1261_s7 }
 0x41a   :  { %v804_v37 = vpop.xlane.xlu1 %803 }
 0x41b   :  { %1222 = vrsqrt.f32 %v804_v37  ;;  %vm810_vm10 = vcmp.eq.f32.partialorder %v804_v37, inf  ;;  %v813_v55 = vand.u32 2147483648, %v804_v37  ;;  %vm812_vm11 = vcmp.eq.f32.partialorder %v804_v37, 0.0 }
 0x41e   :  { %v807_v41 = vpop.xlane.xlu1 %806 }
 0x41f   :  { %1224 = vrsqrt.f32 %v807_v41  ;;  %vm817_vm12 = vcmp.eq.f32.partialorder %v807_v41, inf  ;;  %v820_v60 = vand.u32 2147483648, %v807_v41  ;;  %vm819_vm13 = vcmp.eq.f32.partialorder %v807_v41, 0.0 }
 0x420   :  { %1226 = vrcp.f32 %v787_v47 }
 0x421   :  { %1228 = vrcp.f32 %v788_v53 }
 0x422   :  { %v933_v0 = vpop.permute.xlu1 %932 }
 0x423   :  { %vm935_vm1 = vcmp.eq.s32.totalorder %v933_v0, 1 }
 0x425   :  { %v1223_v49 = vpop.eup %1222 }
 0x426   :  { %v809_v50 = vmul.f32 %v1223_v49, %v804_v37  ;;  %v958_v15 = vpop.permute.xlu1 %957 }
 0x428   :  { %v811_v56 = vsel %vm810_vm10, %v804_v37, %v809_v50 }
 0x429   :  { %v1225_v57 = vpop.eup %1224  ;;  %v814_v58 = vsel %vm812_vm11, %v813_v55, %v811_v56 }
 0x42a   :  { %v822_v59 = vmax.f32 %v814_v58, 1e-12  ;;  %v816_v52 = vmul.f32 %v1225_v57, %v807_v41  ;;  %v1227_v54 = vpop.eup %1226  ;;  %v960_v23 = vpop.permute.xlu1 %959 }
 0x42b   :  { %v1229_v63 = vpop.eup %1228  ;;  %v790_v2 = vmul.f32 %v1227_v54, %v1563_v40 }
 0x42c   :  { %1230 = vrcp.f32 %v822_v59  ;;  %v818_v61 = vsel %vm817_vm12, %v807_v41, %v816_v52  ;;  %v792_v9 = vmul.f32 %v1229_v63, %v1568_v43  ;;  %v919_v43 = vadd.f32 %v1049_v4, %v1629_v31 }
 0x42d   :  { %v821_v62 = vsel %vm819_vm13, %v820_v60, %v818_v61  ;;  %v797_v40 = vmul.f32 %v1047_v5, %v790_v2 }
 0x42e   :  { %v823_v51 = vmax.f32 %v821_v62, 1e-12  ;;  %v798_v17 = vmul.f32 %v1047_v5, %v792_v9 }
 0x430   :  { %1232 = vrcp.f32 %v823_v51 }
 0x436   :  { %v1231_v3 = vpop.eup %1230 }
 0x437   :  { %v825_v7 = vmul.f32 %v1231_v3, %v1609_v16 }
 0x439   :  { %v832_v12 = vmul.f32 %v1048_v6, %v825_v7 }
 0x43a   :  { %v1233_v13 = vpop.eup %1232 }
 0x43b   :  { %v827_v14 = vmul.f32 %v1233_v13, %v1611_v18  ;;  %v834_v1 = vadd.f32 %v832_v12, %v797_v40 }
 0x43d   :  { %v833_v19 = vmul.f32 %v1048_v6, %v827_v14  ;;  %v936_v20 = vsel %vm934_vm14, %v916_v11, %v834_v1  ;;  %v1061_v21 = vpack.c.bf16 %v834_v1, %v834_v1 }
 0x43e   :  { %v1065_v22 = vpack.c.bf16 %v936_v20, %v936_v20 }
 0x43f   :  { %v835_v16 = vadd.f32 %v833_v19, %v798_v17  ;;  %947 = vst.msk [vmem:[#allocation2] sm:$0xf] %vm946_vm15, %v1061_v21 }
 0x440   :  { %974 = vst.msk [vmem:[#allocation2 + $0x4] sm:$0xf] %vm946_vm15, %v1065_v22 }
 0x441   :  { %964 = vst.msk [vmem:[#allocation2] sm:$0xf] %vm963_vm0, %v958_v15  ;;  %v937_v18 = vsel %vm935_vm1, %v919_v43, %v835_v16  ;;  %v1062_v24 = vpack.c.bf16 %v835_v16, %v835_v16 }
 0x442   :  { %v1066_v25 = vpack.c.bf16 %v937_v18, %v937_v18 }
 0x443   :  { %948 = vst.msk [vmem:[#allocation2 + $0x8] sm:$0xf] %vm946_vm15, %v1062_v24 }
 0x444   :  { %975 = vst.msk [vmem:[#allocation2 + $0xc] sm:$0xf] %vm946_vm15, %v1066_v25 }
 0x445   :  { %965 = vst.msk [vmem:[#allocation2 + $0x8] sm:$0xf] %vm963_vm0, %v960_v23 }
 0x446   :  { %1245 = shalt.err (!%p1242_p4)
}
 0x447   :  { %s1246_s22 = scalar_lea.hbm %s1683_s20, 256 }
 0x448   :  { %p1247_p5 = scmp.ne.s32.totalorder %s1683_s20, %s1246_s22  ;;  %p1250_p6 = scmp.lt.u32.totalorder %s1246_s22, %s1683_s20 }
 0x44a   :  { %p1252_p7 = pnand %p1250_p6, %p1247_p5 }
 0x44c   :  { %1255 = shalt.err (!%p1252_p7)
}
 0x44d   :  { %s1263_s8 = smov 128   ;;  %s1264_s9 = smov 8  }
 0x44e   :  { %987 = dma.vmem_to_hbm [thread:$0]  %s982_s0, 256, %s1683_s20, [#allocation3], %s1263_s8, %s1263_s8, %s1264_s9  }
 0x44f   :  { %1256 = dma.done.wait [#allocation3], 256  }
 0x450   :  { %1257 = vsyncadd [#allocation3], 4294967040 }
 0x451   :  { %991 = vsyncpa [#allocation3], 1 }

// kernel: tpu_custom_call.1
= control target key start
LH: loop header
LB: loop body
LE: loop exit
PB: predicated region body
PF: predicated region fallthrough
CT: control target
= control target key end

     0   :  { %s1663_s0 = inlined_call_operand.vmem [shape: f32[2,64], index: 0, kind: input, shape index: {}]   ;;  %s1664_s1 = inlined_call_operand.vmem [shape: f32[16,32], index: 1, kind: input, shape index: {}]   ;;  %s1665_s2 = inlined_call_operand.vmem [shape: f32[16,48], index: 2, kind: input, shape index: {}]   ;;  %s1666_s3 = inlined_call_operand.vmem [shape: f32[16,64], index: 3, kind: input, shape index: {}]   ;;  %s1667_s4 = inlined_call_operand.vmem [shape: f32[16,64], index: 4, kind: input, shape index: {}]   ;;  %s1668_s5 = inlined_call_operand.vmem [shape: f32[16,1], index: 5, kind: input, shape index: {}]   ;;  %s1669_s6 = inlined_call_operand.vmem [shape: bf16[32,32], index: 6, kind: input, shape index: {}]   ;;  %s1670_s7 = inlined_call_operand.vmem [shape: f32[1,32], index: 7, kind: input, shape index: {}]   ;;  %s1671_s8 = inlined_call_operand.vmem [shape: bf16[32,256], index: 8, kind: input, shape index: {}]   ;;  %s1672_s9 = inlined_call_operand.vmem [shape: f32[1,256], index: 9, kind: input, shape index: {}]   ;;  %s1673_s10 = inlined_call_operand.vmem [shape: bf16[256,64], index: 10, kind: input, shape index: {}]   ;;  %s1674_s11 = inlined_call_operand.vmem [shape: f32[1,64], index: 11, kind: input, shape index: {}]   ;;  %s1675_s12 = inlined_call_operand.vmem [shape: bf16[48,48], index: 12, kind: input, shape index: {}]   ;;  %s1676_s13 = inlined_call_operand.vmem [shape: f32[1,48], index: 13, kind: input, shape index: {}]   ;;  %s1677_s14 = inlined_call_operand.vmem [shape: bf16[48,256], index: 14, kind: input, shape index: {}]   ;;  %s1678_s15 = inlined_call_operand.vmem [shape: f32[1,256], index: 15, kind: input, shape index: {}]   ;;  %s1679_s16 = inlined_call_operand.vmem [shape: bf16[256,64], index: 16, kind: input, shape index: {}]   ;;  %s1680_s17 = inlined_call_operand.vmem [shape: f32[1,64], index: 17, kind: input, shape index: {}]   ;;  %s1681_s18 = inlined_call_operand.vmem [shape: bf16[64,64], index: 18, kind: input, shape index: {}]   ;;  %s1682_s19 = inlined_call_operand.vmem [shape: f32[1,64], index: 19, kind: input, shape index: {}]   ;;  %s1683_s20 = inlined_call_operand.hbm [shape: bf16[16,192], index: 20, kind: output, shape index: {}]  }
   0x1   :  { %1689 = sst [smem:[#allocation5_spill]] %s1663_s0 }
   0x2   :  { %1690 = sst [smem:[#allocation6_spill]] %s1664_s1 }
   0x3   :  { %1691 = sst [smem:[#allocation7_spill]] %s1665_s2 }
   0x4   :  { %1692 = sst [smem:[#allocation8_spill]] %s1666_s3 }
   0x5   :  { %1693 = sst [smem:[#allocation9_spill]] %s1667_s4 }
   0x6   :  { %v1162_v0 = vld [vmem:[%s1669_s6] sm:$0xff]   ;;  %v1258_v1 = vmov 0.0   ;;  %v1163_v2 = vld [vmem:[%s1669_s6 + $0x8] sm:$0xff]   ;;  %vm1259_vm0 = vmmov 0   ;;  %s1694_s3 = sld [smem:[#allocation6_spill]]  ;;  %vm93_vm1 = vcmask 261120  }
   0x7   :  { %1123 = vmatprep.subr.bf16.mxu0 %v1258_v1  ;;  %1127 = vmatprep.mubr.msk.bf16.mxu0 %vm1259_vm0, %v1258_v1 }
   0x8   :  { %1124 = vmatpush3.bf16.msra.mxu0 %v1162_v0 }
   0x9   :  { %1125 = vmatprep.subr.bf16.mxu0 %v1258_v1 }
   0xc   :  { %v67_v3 = vld [vmem:[%s1694_s3] sm:$0xff]  ;;  %v68_v4 = vld [vmem:[%s1694_s3 + $0x8] sm:$0xff]  ;;  %1126 = vmatpush3.bf16.msra.mxu0 %v1163_v2 }
   0xd   :  { %v69_v5 = vpack.c.bf16 %v68_v4, %v67_v3 }
   0xf   :  { %1128 = vmatmul.mubr.msk.bf16.vlgmr.msra.gmra.mrb[0].mxu0 %vm93_vm1, %v69_v5 }
  0x10   :  { %25 = vsyncpa [#allocation3], 0  ;;  %v1164_v6 = vld [vmem:[%s1671_s8 + $0x4] ss:$8 sps:$4 sm:$0xff]   ;;  %v1166_v7 = vld [vmem:[%s1671_s8] ss:$8 sps:$4 sm:$0xff]   ;;  %v147_v50 = vlaneseq }
  0x11   :  { %180 = vmatprep.subr.bf16.mxu1 %v1164_v6  ;;  %v1167_v8 = vld [vmem:[%s1671_s8 + $0x14] ss:$8 sps:$4 sm:$0xff]   ;;  %v1169_v9 = vld [vmem:[%s1671_s8 + $0x10] ss:$8 sps:$4 sm:$0xff]   ;;  %v1260_v10 = vmov 0   ;;  %v1173_v11 = vld [vmem:[%s1673_s10 + $0x40] sm:$0xff]  }
  0x12   :  { %181 = vmatpush1.bf16.msra.mxu1 %v1166_v7  ;;  %212 = vmatprep.mubr.bf16.mxu1 %v1260_v10  ;;  %v1174_v12 = vld [vmem:[%s1673_s10] sm:$0xff]   ;;  %v1175_v13 = vld [vmem:[%s1673_s10 + $0x48] sm:$0xff]   ;;  %v1177_v15 = vld [vmem:[%s1673_s10 + $0x50] sm:$0xff]   ;;  %s1695_s0 = sld [smem:[#allocation7_spill]]  ;;  %vm439_vm2 = vcmask 392192   ;;  %v1498_v51 = vshrl.u32 %v147_v50, 7 }
  0x13   :  { %182 = vmatprep.subr.bf16.mxu1 %v1167_v8  ;;  %1161 = vset.pattern.permute.xlu1 %v1260_v10  ;;  %v1176_v14 = vld [vmem:[%s1673_s10 + $0x8] sm:$0xff]   ;;  %v1178_v16 = vld [vmem:[%s1673_s10 + $0x10] sm:$0xff]   ;;  %v1179_v17 = vld [vmem:[%s1673_s10 + $0x58] sm:$0xff]   ;;  %vm766_vm3 = vcmask 523264   ;;  %s1696_s24 = sld [smem:[#allocation8_spill]]  ;;  %vm946_vm15 = vcmask 519168  }
  0x14   :  { %1160 = vset.pattern.permute.xlu0 %v1260_v10  ;;  %1070 = vmatprep.subr.bf16.mxu0 %v1173_v11  ;;  %v1180_v18 = vld [vmem:[%s1673_s10 + $0x18] sm:$0xff]   ;;  %v1181_v19 = vld [vmem:[%s1673_s10 + $0x60] sm:$0xff]   ;;  %v1183_v21 = vld [vmem:[%s1673_s10 + $0x68] sm:$0xff]   ;;  %v149_v52 = vsub.s32 0, %v1498_v51  ;;  %v153_v54 = vsub.s32 1, %v1498_v51 }
  0x15   :  { %1071 = vmatpush3.bf16.msra.mxu0 %v1174_v12  ;;  %v1182_v20 = vld [vmem:[%s1673_s10 + $0x20] sm:$0xff]   ;;  %v1171_v33 = vld [vmem:[%s1675_s12 + $0x8] sm:$0xff]   ;;  %v1172_v34 = vld [vmem:[%s1675_s12 + $0x10] sm:$0xff]  }
  0x16   :  { %183 = vmatpush1.bf16.msra.mxu1 %v1169_v9  ;;  %1072 = vmatprep.subr.bf16.mxu0 %v1175_v13  ;;  %v992_v22 = vld [vmem:[%s1670_s7] ss:$0 sm:$0xff]  ;;  %v1184_v38 = vld [vmem:[%s1673_s10 + $0x28] sm:$0xff]   ;;  %v1185_v39 = vld [vmem:[%s1673_s10 + $0x70] sm:$0xff]   ;;  %s1261_s7 = smov 64  }
  0x17   :  { %1131 = vmatprep.subr.bf16.mxu1 %v1258_v1  ;;  %v1170_v31 = vld [vmem:[%s1675_s12] sm:$0xff]   ;;  %v1186_v40 = vld [vmem:[%s1673_s10 + $0x30] sm:$0xff]   ;;  %v1187_v41 = vld [vmem:[%s1673_s10 + $0x78] sm:$0xff]  }
  0x18   :  { %v405_v35 = vld [vmem:[%s1695_s0] sm:$0xff]  ;;  %v406_v36 = vld [vmem:[%s1695_s0 + $0x8] sm:$0xff]  ;;  %v1188_v42 = vld [vmem:[%s1673_s10 + $0x38] sm:$0xff]  }
  0x19   :  { %1073 = vmatpush3.bf16.msra.mxu0 %v1176_v14  ;;  %v407_v37 = vpack.c.bf16 %v406_v36, %v405_v35  ;;  %v1191_v43 = vld [vmem:[%s1677_s14 + $0x4] ss:$8 sps:$4 sm:$0xff]   ;;  %v1189_v44 = vld [vmem:[%s1677_s14] ss:$8 sps:$4 sm:$0xff]   ;;  %v1194_v45 = vld [vmem:[%s1677_s14 + $0x14] ss:$8 sps:$4 sm:$0xff]  }
  0x1a   :  { %1074 = vmatprep.subr.bf16.mxu0 %v1177_v15  ;;  %v1192_v46 = vld [vmem:[%s1677_s14 + $0x10] ss:$8 sps:$4 sm:$0xff]   ;;  %v1197_v47 = vld [vmem:[%s1677_s14 + $0x24] ss:$8 sps:$4 sm:$0xff]   ;;  %v1195_v48 = vld [vmem:[%s1677_s14 + $0x20] ss:$8 sps:$4 sm:$0xff]  }
  0x1b   :  { %v1198_v49 = vld [vmem:[%s1679_s16 + $0x40] sm:$0xff]  }
  0x1c   :  { %v145_v53 = vld [vmem:[%s1672_s9] sm:$0x3] }
  0x1d   :  { %1075 = vmatpush3.bf16.msra.mxu0 %v1178_v16  ;;  %v150_v55 = vrot.slane %v145_v53, %v149_v52  ;;  %v154_v56 = vrot.slane %v145_v53, %v153_v54  ;;  %v1018_v8 = vld [vmem:[%s1676_s13] ss:$0 sm:$0xff]  ;;  %s1697_s13 = sld [smem:[#allocation9_spill]] }
  0x1e   :  { %1076 = vmatprep.subr.bf16.mxu0 %v1179_v17  ;;  %v1001_v35 = vld [vmem:[%s1674_s11] ss:$0 sm:$0xff]  ;;  %s1698_s11 = sld [smem:[#allocation5_spill]] }
  0x21   :  { %1077 = vmatpush3.bf16.msra.mxu0 %v1180_v18  ;;  %v1199_v18 = vld [vmem:[%s1679_s16] sm:$0xff]  }
  0x22   :  { %1078 = vmatprep.subr.bf16.mxu0 %v1181_v19 }
  0x25   :  { %1079 = vmatpush3.bf16.msra.mxu0 %v1182_v20  ;;  %v1200_v20 = vld [vmem:[%s1679_s16 + $0x48] sm:$0xff]  }
  0x26   :  { %1080 = vmatprep.subr.bf16.mxu0 %v1183_v21  ;;  %v1201_v21 = vld [vmem:[%s1679_s16 + $0x8] sm:$0xff]  }
  0x29   :  { %1081 = vmatpush3.bf16.msra.mxu0 %v1184_v38 }
  0x2a   :  { %1082 = vmatprep.subr.bf16.mxu0 %v1185_v39 }
  0x2d   :  { %1083 = vmatpush3.bf16.msra.mxu0 %v1186_v40 }
  0x2e   :  { %1084 = vmatprep.subr.bf16.mxu0 %v1187_v41 }
  0x31   :  { %1085 = vmatpush3.bf16.msra.mxu0 %v1188_v42  ;;  %v493_v42 = vld [vmem:[%s1678_s15] sm:$0x3] }
  0x32   :  { %1141 = vmatprep.subr.bf16.mxu0 %v1258_v1 }
  0xe2   :  { %v131_v23 = vpop.f32.mrb[0].mxu0 }
  0xe3   :  { %v132_v24 = vadd.f32 %v992_v22, %v131_v23  ;;  %v1129_v25 = vpop.f32.mrb[1].mxu0  ;;  %v1203_v23 = vld [vmem:[%s1679_s16 + $0x10] sm:$0xff]  }
  0xe4   :  { %v134_v26 = vpop.f32.mrb[2].mxu0  ;;  %v1205_v25 = vld [vmem:[%s1679_s16 + $0x18] sm:$0xff]  }
  0xe5   :  { %v135_v27 = vadd.f32 %v992_v22, %v134_v26  ;;  %v1130_v28 = vpop.f32.mrb[3].mxu0  ;;  %v138_v29 = vmax.f32 %v132_v24, 0.0  ;;  %v1202_v22 = vld [vmem:[%s1679_s16 + $0x50] sm:$0xff]   ;;  %v1204_v24 = vld [vmem:[%s1679_s16 + $0x58] sm:$0xff]   ;;  %v1206_v26 = vld [vmem:[%s1679_s16 + $0x60] sm:$0xff]  }
  0xe6   :  { %v1208_v28 = vld [vmem:[%s1679_s16 + $0x68] sm:$0xff]  }
  0xe7   :  { %v139_v30 = vmax.f32 %v135_v27, 0.0  ;;  %v1207_v27 = vld [vmem:[%s1679_s16 + $0x20] sm:$0xff]  }
  0xe9   :  { %v140_v32 = vpack.c.bf16 %v139_v30, %v138_v29  ;;  %v1209_v29 = vld [vmem:[%s1679_s16 + $0x28] sm:$0xff]   ;;  %v1210_v30 = vld [vmem:[%s1679_s16 + $0x70] sm:$0xff]  }
  0xeb   :  { %1000 = vmatmul.mubr.msk.bf16.vlgmr.msra.gmra.mrb[0].mxu1 %vm93_vm1, %v140_v32  ;;  %v1212_v32 = vld [vmem:[%s1679_s16 + $0x78] sm:$0xff]  }
  0xec   :  { %1132 = vmatpush3.bf16.msra.mxu1 %v1170_v31  ;;  %1137 = vmatprep.mubr.msk.bf16.mxu1 %vm1259_vm0, %v1258_v1  ;;  %v1211_v31 = vld [vmem:[%s1679_s16 + $0x30] sm:$0xff]  }
  0xed   :  { %1133 = vmatprep.subr.bf16.mxu1 %v1258_v1 }
  0xf0   :  { %1134 = vmatpush3.bf16.msra.mxu1 %v1171_v33  ;;  %v1213_v33 = vld [vmem:[%s1679_s16 + $0x38] sm:$0xff]  }
  0xf1   :  { %1135 = vmatprep.subr.bf16.mxu1 %v1258_v1 }
  0xf4   :  { %1136 = vmatpush3.bf16.msra.mxu1 %v1172_v34 }
  0xf5   :  { %538 = vmatprep.subr.bf16.mxu1 %v1191_v43 }
  0xf7   :  { %1138 = vmatmul.mubr.msk.bf16.vlgmr.msra.gmra.mrb[4].mxu1 %vm439_vm2, %v407_v37 }
  0xf8   :  { %570 = vmatprep.mubr.bf16.mxu1 %v1260_v10  ;;  %539 = vmatpush1.bf16.msra.mxu1 %v1189_v44 }
  0xf9   :  { %540 = vmatprep.subr.bf16.mxu1 %v1194_v45  ;;  %v498_v45 = vrot.slane %v493_v42, %v149_v52 }
  0xfc   :  { %541 = vmatpush1.bf16.msra.mxu1 %v1192_v46 }
  0xfd   :  { %542 = vmatprep.subr.bf16.mxu1 %v1197_v47  ;;  %v502_v47 = vrot.slane %v493_v42, %v153_v54 }
 0x100   :  { %543 = vmatpush1.bf16.msra.mxu1 %v1195_v48 }
 0x101   :  { %1096 = vmatprep.subr.bf16.mxu1 %v1198_v49 }
 0x1be   :  { %v214_v57 = vpop.f32.mrb[0].mxu1 }
 0x1bf   :  { %v215_v58 = vadd.f32 %v214_v57, %v150_v55  ;;  %v216_v59 = vpop.f32.mrb[1].mxu1 }
 0x1c0   :  { %v217_v60 = vadd.f32 %v216_v59, %v154_v56  ;;  %v218_v61 = vpop.f32.mrb[2].mxu1 }
 0x1c1   :  { %v219_v62 = vadd.f32 %v218_v61, %v150_v55  ;;  %v220_v63 = vpop.f32.mrb[3].mxu1  ;;  %v223_v2 = vmax.f32 %v215_v58, 0.0 }
 0x1c2   :  { %v221_v0 = vadd.f32 %v220_v63, %v154_v56  ;;  %v224_v4 = vmax.f32 %v217_v60, 0.0 }
 0x1c3   :  { %v225_v3 = vmax.f32 %v219_v62, 0.0 }
 0x1c4   :  { %v226_v5 = vmax.f32 %v221_v0, 0.0  ;;  %v1214_v0 = vld [vmem:[%s1681_s18] sm:$0xff]  }
 0x1c5   :  { %v227_v6 = vpack.c.bf16 %v225_v3, %v223_v2  ;;  %v1215_v2 = vld [vmem:[%s1681_s18 + $0x8] sm:$0xff]   ;;  %v1216_v3 = vld [vmem:[%s1681_s18 + $0x10] sm:$0xff]  }
 0x1c6   :  { %v228_v7 = vpack.c.bf16 %v226_v5, %v224_v4  ;;  %v1217_v4 = vld [vmem:[%s1681_s18 + $0x18] sm:$0xff]   ;;  %v836_v5 = vld [vmem:[%s1696_s24] sm:$0xff] }
 0x1c8   :  { %396 = vmatprep.mubr.bf16.mxu0 %v228_v7 }
 0x1c9   :  { %397 = vmatmul.mubr.bf16.vlgmr.msra.gmra.mrb[4].mxu0 %v227_v6  ;;  %v837_v6 = vld [vmem:[%s1696_s24 + $0x8] sm:$0xff] }
 0x1ca   :  { %v477_v9 = vpop.f32.mrb[4].mxu1  ;;  %1149 = vmatprep.mubr.msk.bf16.mxu0 %vm1259_vm0, %v1258_v1  ;;  %1142 = vmatpush3.bf16.msra.mxu0 %v1214_v0  ;;  %v838_v7 = vpack.c.bf16 %v837_v6, %v836_v5  ;;  %v1047_v5 = vld [vmem:[%s1698_s11] ss:$0 sm:$0xff]  ;;  %v1048_v6 = vld [vmem:[%s1698_s11 + $0x1] ss:$0 sm:$0xff]  ;;  %vm963_vm0 = vcmask 1043968  }
 0x1cb   :  { %v478_v11 = vadd.f32 %v1018_v8, %v477_v9  ;;  %v1139_v12 = vpop.f32.mrb[5].mxu1  ;;  %1143 = vmatprep.subr.bf16.mxu0 %v1258_v1 }
 0x1cc   :  { %v480_v13 = vpop.f32.mrb[6].mxu1  ;;  %v1030_v12 = vld [vmem:[%s1680_s17] ss:$0 sm:$0xff] }
 0x1cd   :  { %v481_v14 = vadd.f32 %v1018_v8, %v480_v13  ;;  %v1140_v15 = vpop.f32.mrb[7].mxu1  ;;  %v484_v16 = vmax.f32 %v478_v11, 0.0  ;;  %v922_v8 = vld [vmem:[%s1668_s5] sm:$0xff] }
 0x1ce   :  { %1144 = vmatpush3.bf16.msra.mxu0 %v1215_v2  ;;  %vm924_vm4 = vcmp.gt.f32.partialorder %v922_v8, 0.5 }
 0x1cf   :  { %v485_v17 = vmax.f32 %v481_v14, 0.0  ;;  %1145 = vmatprep.subr.bf16.mxu0 %v1258_v1  ;;  %v926_v9 = vsel %vm924_vm4, 1, %v1260_v10 }
 0x1d1   :  { %v486_v19 = vpack.c.bf16 %v485_v17, %v484_v16 }
 0x1d2   :  { %1146 = vmatpush3.bf16.msra.mxu0 %v1216_v3 }
 0x1d3   :  { %1029 = vmatmul.mubr.msk.bf16.vlgmr.msra.gmra.mrb[8].mxu1 %vm439_vm2, %v486_v19  ;;  %1147 = vmatprep.subr.bf16.mxu0 %v1258_v1 }
 0x1d4   :  { %1097 = vmatpush3.bf16.msra.mxu1 %v1199_v18 }
 0x1d5   :  { %1098 = vmatprep.subr.bf16.mxu1 %v1200_v20 }
 0x1d6   :  { %1148 = vmatpush3.bf16.msra.mxu0 %v1217_v4  ;;  %v1049_v4 = vld [vmem:[%s1682_s19] ss:$0 sm:$0xff]  ;;  %s1262_s19 = smov [#allocation2]  }
 0x1d7   :  { %s981_s0 = sshll.u32 %s1262_s19, 4  ;;  %s982_s0 = int_to_ptr.vmem [resolvable:$true] %s981_s0 }
 0x1d8   :  { %1099 = vmatpush3.bf16.msra.mxu1 %v1201_v21  ;;  %s1234_s10 = scalar_lea.vmem %s982_s0, 256  ;;  %p1239_p1 = scmp.lt.s32.totalorder %s982_s0, %s982_s0 }
 0x1d9   :  { %1100 = vmatprep.subr.bf16.mxu1 %v1202_v22  ;;  %1150 = vmatmul.mubr.msk.bf16.vlgmr.msra.gmra.mrb[8].mxu0 %vm766_vm3, %v838_v7  ;;  %p1235_p0 = scmp.ne.s32.totalorder %s982_s0, %s1234_s10  ;;  %p1240_p2 = scmp.lt.s32.totalorder %s1234_s10, %s1234_s10 }
 0x1db   :  { %p1241_p3 = por %p1240_p2, %p1239_p1 }
 0x1dc   :  { %1101 = vmatpush3.bf16.msra.mxu1 %v1203_v23  ;;  %v923_v23 = vld [vmem:[%s1668_s5 + $0x8] sm:$0xff] }
 0x1dd   :  { %1102 = vmatprep.subr.bf16.mxu1 %v1204_v24  ;;  %vm925_vm5 = vcmp.gt.f32.partialorder %v923_v23, 0.5  ;;  %p1242_p4 = pnand %p1241_p3, %p1235_p0 }
 0x1de   :  { %v927_v24 = vsel %vm925_vm5, 1, %v1260_v10 }
 0x1e0   :  { %1103 = vmatpush3.bf16.msra.mxu1 %v1205_v25  ;;  %v949_v25 = vld [vmem:[%s1697_s13] sm:$0xff] }
 0x1e1   :  { %1104 = vmatprep.subr.bf16.mxu1 %v1206_v26  ;;  %v1063_v26 = vpack.c.bf16 %v949_v25, %v949_v25 }
 0x1e4   :  { %1105 = vmatpush3.bf16.msra.mxu1 %v1207_v27  ;;  %v950_v27 = vld [vmem:[%s1697_s13 + $0x8] sm:$0xff] }
 0x1e5   :  { %1106 = vmatprep.subr.bf16.mxu1 %v1208_v28  ;;  %v1064_v28 = vpack.c.bf16 %v950_v27, %v950_v27 }
 0x1e8   :  { %1107 = vmatpush3.bf16.msra.mxu1 %v1209_v29 }
 0x1e9   :  { %1108 = vmatprep.subr.bf16.mxu1 %v1210_v30 }
 0x1ec   :  { %1109 = vmatpush3.bf16.msra.mxu1 %v1211_v31 }
 0x1ed   :  { %1110 = vmatprep.subr.bf16.mxu1 %v1212_v32 }
 0x1f0   :  { %1111 = vmatpush3.bf16.msra.mxu1 %v1213_v33 }
 0x29c   :  { %v1086_v34 = vpop.f32.mrb[4].mxu0 }
 0x29d   :  { %v1087_v36 = vpop.f32.mrb[5].mxu0 }
 0x29e   :  { %v1088_v37 = vadd.f32 %v1087_v36, %v1086_v34  ;;  %v1089_v38 = vpop.f32.mrb[6].mxu0 }
 0x29f   :  { %v1090_v39 = vpop.f32.mrb[7].mxu0 }
 0x2a0   :  { %v1563_v40 = vadd.f32 %v1088_v37, %v1001_v35  ;;  %v1091_v41 = vadd.f32 %v1090_v39, %v1089_v38 }
 0x2a2   :  { %v1568_v43 = vadd.f32 %v1091_v41, %v1001_v35  ;;  %v764_v44 = vmul.f32 %v1563_v40, %v1563_v40 }
 0x2a4   :  { %v767_v46 = vsel %vm766_vm3, %v764_v44, 0.0  ;;  %v765_v48 = vmul.f32 %v1568_v43, %v1568_v43 }
 0x2a5   :  { %768 = vadd.xlane.f32.xlu0 %v767_v46 }
 0x2a6   :  { %v572_v49 = vpop.f32.mrb[8].mxu1  ;;  %v770_v57 = vsel %vm766_vm3, %v765_v48, 0.0 }
 0x2a7   :  { %v573_v50 = vadd.f32 %v572_v49, %v498_v45  ;;  %v574_v53 = vpop.f32.mrb[9].mxu1 }
 0x2a8   :  { %v575_v55 = vadd.f32 %v574_v53, %v502_v47  ;;  %v576_v56 = vpop.f32.mrb[10].mxu1 }
 0x2a9   :  { %v577_v58 = vadd.f32 %v576_v56, %v498_v45  ;;  %v578_v59 = vpop.f32.mrb[11].mxu1  ;;  %771 = vadd.xlane.f32.xlu0 %v770_v57  ;;  %v581_v60 = vmax.f32 %v573_v50, 0.0 }
 0x2aa   :  { %v579_v52 = vadd.f32 %v578_v59, %v502_v47  ;;  %v582_v62 = vmax.f32 %v575_v55, 0.0 }
 0x2ab   :  { %v583_v61 = vmax.f32 %v577_v58, 0.0 }
 0x2ac   :  { %v584_v51 = vmax.f32 %v579_v52, 0.0  ;;  %v915_v29 = vpop.f32.mrb[8].mxu0 }
 0x2ad   :  { %v585_v54 = vpack.c.bf16 %v583_v61, %v581_v60  ;;  %v1151_v30 = vpop.f32.mrb[9].mxu0 }
 0x2ae   :  { %v586_v63 = vpack.c.bf16 %v584_v51, %v582_v62  ;;  %v1629_v31 = vpop.f32.mrb[10].mxu0 }
 0x2af   :  { %v1152_v32 = vpop.f32.mrb[11].mxu0 }
 0x2b0   :  { %754 = vmatprep.mubr.bf16.mxu1 %v586_v63 }
 0x2b1   :  { %755 = vmatmul.mubr.bf16.vlgmr.msra.gmra.mrb[12].mxu1 %v585_v54 }
 0x2bf   :  { %929 = vperm.xlu0 %1160, %v926_v9  }
 0x332   :  { %v769_v10 = vpop.xlane.xlu0 %768 }
 0x333   :  { %1218 = vrsqrt.f32 %v769_v10  ;;  %vm775_vm6 = vcmp.eq.f32.partialorder %v769_v10, inf  ;;  %v778_v42 = vand.u32 2147483648, %v769_v10  ;;  %vm777_vm7 = vcmp.eq.f32.partialorder %v769_v10, 0.0 }
 0x336   :  { %v772_v33 = vpop.xlane.xlu0 %771 }
 0x337   :  { %1220 = vrsqrt.f32 %v772_v33  ;;  %vm782_vm8 = vcmp.eq.f32.partialorder %v772_v33, inf  ;;  %v785_v46 = vand.u32 2147483648, %v772_v33  ;;  %vm784_vm9 = vcmp.eq.f32.partialorder %v772_v33, 0.0 }
 0x33d   :  { %v1219_v34 = vpop.eup %1218 }
 0x33e   :  { %v774_v36 = vmul.f32 %v1219_v34, %v769_v10  ;;  %v930_v8 = vpop.permute.xlu0 %929 }
 0x33f   :  { %vm934_vm14 = vcmp.eq.s32.totalorder %v930_v8, 1 }
 0x340   :  { %v776_v39 = vsel %vm775_vm6, %v769_v10, %v774_v36 }
 0x341   :  { %v1221_v35 = vpop.eup %1220  ;;  %v779_v44 = vsel %vm777_vm7, %v778_v42, %v776_v39 }
 0x342   :  { %v781_v38 = vmul.f32 %v1221_v35, %v772_v33  ;;  %v787_v47 = vmax.f32 %v779_v44, 1e-12 }
 0x344   :  { %v783_v45 = vsel %vm782_vm8, %v772_v33, %v781_v38 }
 0x345   :  { %v786_v48 = vsel %vm784_vm9, %v785_v46, %v783_v45 }
 0x346   :  { %v788_v53 = vmax.f32 %v786_v48, 1e-12 }
 0x384   :  { %v1112_v11 = vpop.f32.mrb[12].mxu1 }
 0x385   :  { %v1113_v13 = vpop.f32.mrb[13].mxu1 }
 0x386   :  { %v1114_v14 = vadd.f32 %v1113_v13, %v1112_v11  ;;  %v1115_v1 = vpop.f32.mrb[14].mxu1  ;;  %v916_v11 = vadd.f32 %v1049_v4, %v915_v29 }
 0x387   :  { %v1116_v15 = vpop.f32.mrb[15].mxu1 }
 0x388   :  { %v1609_v16 = vadd.f32 %v1114_v14, %v1030_v12  ;;  %v1117_v17 = vadd.f32 %v1116_v15, %v1115_v1 }
 0x38a   :  { %v1611_v18 = vadd.f32 %v1117_v17, %v1030_v12  ;;  %v800_v19 = vmul.f32 %v1609_v16, %v1609_v16 }
 0x38c   :  { %v802_v20 = vsel %vm766_vm3, %v800_v19, 0.0  ;;  %v801_v21 = vmul.f32 %v1611_v18, %v1611_v18 }
 0x38d   :  { %803 = vadd.xlane.f32.xlu1 %v802_v20 }
 0x38e   :  { %v805_v22 = vsel %vm766_vm3, %v801_v21, 0.0 }
 0x391   :  { %806 = vadd.xlane.f32.xlu1 %v805_v22 }
 0x3a2   :  { %932 = vperm.xlu1 %1161, %v927_v24  }
 0x3a6   :  { %957 = vrot.lane.b32.xlu1 %v1063_v26, %s1261_s7 }
 0x3aa   :  { %959 = vrot.lane.b32.xlu1 %v1064_v28, %s1261_s7 }
 0x41a   :  { %v804_v37 = vpop.xlane.xlu1 %803 }
 0x41b   :  { %1222 = vrsqrt.f32 %v804_v37  ;;  %vm810_vm10 = vcmp.eq.f32.partialorder %v804_v37, inf  ;;  %v813_v55 = vand.u32 2147483648, %v804_v37  ;;  %vm812_vm11 = vcmp.eq.f32.partialorder %v804_v37, 0.0 }
 0x41e   :  { %v807_v41 = vpop.xlane.xlu1 %806 }
 0x41f   :  { %1224 = vrsqrt.f32 %v807_v41  ;;  %vm817_vm12 = vcmp.eq.f32.partialorder %v807_v41, inf  ;;  %v820_v60 = vand.u32 2147483648, %v807_v41  ;;  %vm819_vm13 = vcmp.eq.f32.partialorder %v807_v41, 0.0 }
 0x420   :  { %1226 = vrcp.f32 %v787_v47 }
 0x421   :  { %1228 = vrcp.f32 %v788_v53 }
 0x422   :  { %v933_v0 = vpop.permute.xlu1 %932 }
 0x423   :  { %vm935_vm1 = vcmp.eq.s32.totalorder %v933_v0, 1 }
 0x425   :  { %v1223_v49 = vpop.eup %1222 }
 0x426   :  { %v809_v50 = vmul.f32 %v1223_v49, %v804_v37  ;;  %v958_v15 = vpop.permute.xlu1 %957 }
 0x428   :  { %v811_v56 = vsel %vm810_vm10, %v804_v37, %v809_v50 }
 0x429   :  { %v1225_v57 = vpop.eup %1224  ;;  %v814_v58 = vsel %vm812_vm11, %v813_v55, %v811_v56 }
 0x42a   :  { %v822_v59 = vmax.f32 %v814_v58, 1e-12  ;;  %v816_v52 = vmul.f32 %v1225_v57, %v807_v41  ;;  %v1227_v54 = vpop.eup %1226  ;;  %v960_v23 = vpop.permute.xlu1 %959 }
 0x42b   :  { %v1229_v63 = vpop.eup %1228  ;;  %v790_v2 = vmul.f32 %v1227_v54, %v1563_v40 }
 0x42c   :  { %1230 = vrcp.f32 %v822_v59  ;;  %v818_v61 = vsel %vm817_vm12, %v807_v41, %v816_v52  ;;  %v792_v9 = vmul.f32 %v1229_v63, %v1568_v43  ;;  %v919_v43 = vadd.f32 %v1049_v4, %v1629_v31 }
 0x42d   :  { %v821_v62 = vsel %vm819_vm13, %v820_v60, %v818_v61  ;;  %v797_v40 = vmul.f32 %v1047_v5, %v790_v2 }
 0x42e   :  { %v823_v51 = vmax.f32 %v821_v62, 1e-12  ;;  %v798_v17 = vmul.f32 %v1047_v5, %v792_v9 }
 0x430   :  { %1232 = vrcp.f32 %v823_v51 }
 0x436   :  { %v1231_v3 = vpop.eup %1230 }
 0x437   :  { %v825_v7 = vmul.f32 %v1231_v3, %v1609_v16 }
 0x439   :  { %v832_v12 = vmul.f32 %v1048_v6, %v825_v7 }
 0x43a   :  { %v1233_v13 = vpop.eup %1232 }
 0x43b   :  { %v827_v14 = vmul.f32 %v1233_v13, %v1611_v18  ;;  %v834_v1 = vadd.f32 %v832_v12, %v797_v40 }
 0x43d   :  { %v833_v19 = vmul.f32 %v1048_v6, %v827_v14  ;;  %v936_v20 = vsel %vm934_vm14, %v916_v11, %v834_v1  ;;  %v1061_v21 = vpack.c.bf16 %v834_v1, %v834_v1 }
 0x43e   :  { %v1065_v22 = vpack.c.bf16 %v936_v20, %v936_v20 }
 0x43f   :  { %v835_v16 = vadd.f32 %v833_v19, %v798_v17  ;;  %947 = vst.msk [vmem:[#allocation2] sm:$0xf] %vm946_vm15, %v1061_v21 }
 0x440   :  { %974 = vst.msk [vmem:[#allocation2 + $0x4] sm:$0xf] %vm946_vm15, %v1065_v22 }
 0x441   :  { %964 = vst.msk [vmem:[#allocation2] sm:$0xf] %vm963_vm0, %v958_v15  ;;  %v937_v18 = vsel %vm935_vm1, %v919_v43, %v835_v16  ;;  %v1062_v24 = vpack.c.bf16 %v835_v16, %v835_v16 }
 0x442   :  { %v1066_v25 = vpack.c.bf16 %v937_v18, %v937_v18 }
 0x443   :  { %948 = vst.msk [vmem:[#allocation2 + $0x8] sm:$0xf] %vm946_vm15, %v1062_v24 }
 0x444   :  { %975 = vst.msk [vmem:[#allocation2 + $0xc] sm:$0xf] %vm946_vm15, %v1066_v25 }
 0x445   :  { %965 = vst.msk [vmem:[#allocation2 + $0x8] sm:$0xf] %vm963_vm0, %v960_v23 }
 0x446   :  { %1245 = shalt.err (!%p1242_p4)
}
 0x447   :  { %s1246_s22 = scalar_lea.hbm %s1683_s20, 256 }
 0x448   :  { %p1247_p5 = scmp.ne.s32.totalorder %s1683_s20, %s1246_s22  ;;  %p1250_p6 = scmp.lt.u32.totalorder %s1246_s22, %s1683_s20 }
 0x44a   :  { %p1252_p7 = pnand %p1250_p6, %p1247_p5 }
 0x44c   :  { %1255 = shalt.err (!%p1252_p7)
}
 0x44d   :  { %s1263_s8 = smov 128   ;;  %s1264_s9 = smov 8  }
 0x44e   :  { %987 = dma.vmem_to_hbm [thread:$0]  %s982_s0, 256, %s1683_s20, [#allocation3], %s1263_s8, %s1263_s8, %s1264_s9  }
 0x44f   :  { %1256 = dma.done.wait [#allocation3], 256  }
 0x450   :  { %1257 = vsyncadd [#allocation3], 4294967040 }
 0x451   :  { %991 = vsyncpa [#allocation3], 1 }

</bundles_post_ra>
